<compile_context>
chip_gen: v6e
topology: v6e:2x2x1
jax: 0.10.0
libtpu: 0.0.40
codegen_flags: <defaults>
</compile_context>

<pallas_src>
import functools
import numpy as np
import jax
import jax.numpy as jnp
from jax.experimental import pallas as pl
from jax.experimental.pallas import tpu as pltpu


_LAYER_KEYS = ("wqkv", "bqkv", "wo", "bo", "g1", "b1",
               "w1", "bf1", "w2", "bf2", "g2", "b2")


# ----------------------------------------------------------------------------
# Shared in-kernel compute helpers
# ----------------------------------------------------------------------------

def _ln(x, g, b, eps=1e-5):
    mu = jnp.mean(x, axis=-1, keepdims=True)
    var = jnp.mean(jnp.square(x - mu), axis=-1, keepdims=True)
    return (x - mu) * jax.lax.rsqrt(var + eps) * g + b


# TODO(synk): TransformerEncoder internals are external to the provided module;
# a single post-norm self-attention + FFN layer is used as a stand-in.
def _txf_compute(x, kbias, D, wqkv, bqkv, wo, bo, g1, b1,
                 w1, bf1, w2, bf2, g2, b2):
    """Post-norm self-attention + FFN on one (T, D) block, VMEM resident.

    All matmuls run on the MXU in bf16 with f32 accumulation.  1/sqrt(D) is
    pre-folded into the Q columns of wqkv/bqkv at parameter-prep time.  kbias
    is a (1, T) additive key-padding bias (0 valid / -1e9 padded)."""
    xf = x.astype(jnp.float32)
    xb = x.astype(jnp.bfloat16)
    qkv = jnp.dot(xb, wqkv, preferred_element_type=jnp.float32) + bqkv
    q = qkv[:, :D].astype(jnp.bfloat16)
    k = qkv[:, D:2 * D].astype(jnp.bfloat16)
    v = qkv[:, 2 * D:].astype(jnp.bfloat16)
    s = jax.lax.dot_general(q, k, (((1,), (1,)), ((), ())),
                            preferred_element_type=jnp.float32)   # q @ k.T
    s = s + kbias
    s = s - jnp.max(s, axis=-1, keepdims=True)
    e = jnp.exp(s)
    p = e * pl.reciprocal(jnp.sum(e, axis=-1, keepdims=True), approx=True)
    a = jnp.dot(p.astype(jnp.bfloat16), v, preferred_element_type=jnp.float32)
    a = jnp.dot(a.astype(jnp.bfloat16), wo,
                preferred_element_type=jnp.float32) + bo
    x1 = _ln(a + xf, g1, b1)
    h = jnp.maximum(
        jnp.dot(x1.astype(jnp.bfloat16), w1,
                preferred_element_type=jnp.float32) + bf1, 0.0)
    h = jnp.dot(h.astype(jnp.bfloat16), w2,
                preferred_element_type=jnp.float32) + bf2
    return _ln(h + x1, g2, b2)


# ----------------------------------------------------------------------------
# Pallas kernels
# ----------------------------------------------------------------------------

def _encoder_kernel(T, D, len_ref, tok, pe, acc, spk, role,
                    wqkv, bqkv, wo, bo, g1, b1, w1, bf1, w2, bf2, g2, b2,
                    o_ref):
    ln = len_ref[pl.program_id(0)]
    x = tok[...] + pe[...] + acc[...] + spk[...] + role[...]          # (T, D)
    t_col = jax.lax.broadcasted_iota(jnp.int32, (T, 1), 0)
    x = x * (t_col < ln).astype(jnp.float32)                          # x*mask
    k_row = jax.lax.broadcasted_iota(jnp.int32, (1, T), 1)
    kbias = jnp.where(k_row < ln, 0.0, -1e9).astype(jnp.float32)
    y = _txf_compute(x, kbias, D, wqkv[...], bqkv[...], wo[...], bo[...],
                     g1[...], b1[...], w1[...], bf1[...], w2[...], bf2[...],
                     g2[...], b2[...])
    o_ref[...] = y.astype(o_ref.dtype)


def _pred_kernel(T, D, len_ref, x_ref,
                 wqkv, bqkv, wo, bo, g1, b1, w1, bf1, w2, bf2, g2, b2,
                 wfin, bfin, o_ref):
    ln = len_ref[pl.program_id(1)]
    k_row = jax.lax.broadcasted_iota(jnp.int32, (1, T), 1)
    kbias = jnp.where(k_row < ln, 0.0, -1e9).astype(jnp.float32)
    y = _txf_compute(x_ref[...], kbias, D, wqkv[...], bqkv[...], wo[...],
                     bo[...], g1[...], b1[...], w1[...], bf1[...], w2[...],
                     bf2[...], g2[...], b2[...])
    # N=1 head as a (1,D)x(T,D)->(1,T) dot so the store stays lane-dense.
    head = jax.lax.dot_general(
        wfin[...].astype(jnp.bfloat16), y.astype(jnp.bfloat16),
        (((1,), (1,)), ((), ())), preferred_element_type=jnp.float32)
    o_ref[...] = head + bfin[...]


def _decoder_kernel(T, T_mel, D, K, inlen_ref, mellen_ref,
                    idx_ref, x_ref, pitch_ref, cw_ref, cb_ref,
                    wqkv, bqkv, wo, bo, g1, b1, w1, bf1, w2, bf2, g2, b2,
                    mw_ref, mb_ref, o_ref):
    b = pl.program_id(0)
    ln = inlen_ref[b]
    ml = mellen_ref[b]
    pad = (K - 1) // 2

    idx_col = idx_ref[...]                                   # (T_mel, 1) int32
    tok_row = jax.lax.broadcasted_iota(jnp.int32, (1, T), 1)
    onehot = jnp.logical_and(idx_col == tok_row,
                             tok_row < ln).astype(jnp.float32)   # (T_mel, T)

    # repeat_interleave + pad_sequence as a one-hot matmul (MXU, bf16).
    xr = jnp.dot(onehot.astype(jnp.bfloat16),
                 x_ref[...].astype(jnp.bfloat16),
                 preferred_element_type=jnp.float32)             # (T_mel, D)
    # Aligned pitch via VPU multiply + lane reduce (no 1-column matmul).
    aligned = jnp.sum(onehot * pitch_ref[...], axis=-1, keepdims=True)

    # Conv1d(1, D, K, padding=pad): K XLU sublane rolls + VPU FMAs.
    cw = cw_ref[...]
    out = xr + cb_ref[...]
    m_col = jax.lax.broadcasted_iota(jnp.int32, (T_mel, 1), 0)
    for j in range(K):
        sh = pad - j                       # shifted[t] = aligned[t - sh]
        if sh == 0:
            shifted = aligned
        else:
            rolled = pltpu.roll(aligned, shift=sh % T_mel, axis=0)
            valid = (m_col >= sh) if sh > 0 else (m_col < T_mel + sh)
            shifted = jnp.where(valid, rolled, 0.0)
        out = out + shifted * cw[j:j + 1, :]

    f_row = jax.lax.broadcasted_iota(jnp.int32, (1, T_mel), 1)
    kbias = jnp.where(f_row < ml, 0.0, -1e9).astype(jnp.float32)
    y = _txf_compute(out, kbias, D, wqkv[...], bqkv[...], wo[...], bo[...],
                     g1[...], b1[...], w1[...], bf1[...], w2[...], bf2[...],
                     g2[...], b2[...])
    o_ref[...] = (jnp.dot(y.astype(jnp.bfloat16), mw_ref[...],
                          preferred_element_type=jnp.float32)
                  + mb_ref[...]).astype(o_ref.dtype)


# ----------------------------------------------------------------------------
# pallas_call wrappers
# ----------------------------------------------------------------------------

def _wspec(shape):
    """Constant-index weight spec: single-buffered (weights never change)."""
    nd = len(shape)
    return pl.BlockSpec(shape, lambda *_: (0,) * nd,
                        pipeline_mode=pl.Buffered(1))


def encoder_fuse(input_lengths, tok, pe, acc, spk, role, lp):
    B, T, D = tok.shape
    ws = [lp[k] for k in _LAYER_KEYS]
    return pl.pallas_call(
        functools.partial(_encoder_kernel, T, D),
        out_shape=jax.ShapeDtypeStruct((B, T, D), jnp.bfloat16),
        grid_spec=pltpu.PrefetchScalarGridSpec(
            num_scalar_prefetch=1, grid=(B,),
            in_specs=[pl.BlockSpec((None, T, D), lambda b, L: (b, 0, 0)),
                      _wspec((T, D)),
                      pl.BlockSpec((None, T, D), lambda b, L: (b, 0, 0)),
                      pl.BlockSpec((None, 1, D), lambda b, L: (b, 0, 0)),
                      pl.BlockSpec((None, 1, D), lambda b, L: (b, 0, 0))]
                     + [_wspec(w.shape) for w in ws],
            out_specs=pl.BlockSpec((None, T, D), lambda b, L: (b, 0, 0))),
        compiler_params=pltpu.CompilerParams(
            dimension_semantics=("parallel",)),
    )(input_lengths, tok, pe, acc, spk, role, *ws)


def temporal_predictors(input_lengths, x, sp):
    """Duration + pitch estimators on one grid=(2, B) kernel (stacked weights).

    Returns (2, B, T) f32: [0] = log_dur_pred, [1] = pitch_pred."""
    B, T, D = x.shape
    ws = [sp[k] for k in _LAYER_KEYS]

    def stk(a):
        nd = a.ndim
        return pl.BlockSpec((None,) + a.shape[1:],
                            lambda p, b, L: (p,) + (0,) * (nd - 1))

    out = pl.pallas_call(
        functools.partial(_pred_kernel, T, D),
        out_shape=jax.ShapeDtypeStruct((2, B, 1, T), jnp.float32),
        grid_spec=pltpu.PrefetchScalarGridSpec(
            num_scalar_prefetch=1, grid=(2, B),
            in_specs=[pl.BlockSpec((None, T, D), lambda p, b, L: (b, 0, 0))]
                     + [stk(w) for w in ws]
                     + [stk(sp["wfin"]), stk(sp["bfin"])],
            out_specs=pl.BlockSpec((None, None, 1, T),
                                   lambda p, b, L: (p, b, 0, 0))),
        compiler_params=pltpu.CompilerParams(
            dimension_semantics=("parallel", "parallel")),
    )(input_lengths, x, *ws, sp["wfin"], sp["bfin"])
    return out.reshape(2, B, T)


def decoder_fuse(input_lengths, mel_lengths, rep_idx, x, pitch_row,
                 conv_w, conv_b, lp, mel_w, mel_b):
    B, T, D = x.shape
    T_mel = rep_idx.shape[1]
    K = conv_w.shape[0]
    MELP = mel_w.shape[1]
    ws = [lp[k] for k in _LAYER_KEYS]
    return pl.pallas_call(
        functools.partial(_decoder_kernel, T, T_mel, D, K),
        out_shape=jax.ShapeDtypeStruct((B, T_mel, MELP), jnp.float32),
        grid_spec=pltpu.PrefetchScalarGridSpec(
            num_scalar_prefetch=2, grid=(B,),
            in_specs=[pl.BlockSpec((None, T_mel, 1),
                                   lambda b, L1, L2: (b, 0, 0)),
                      pl.BlockSpec((None, T, D), lambda b, L1, L2: (b, 0, 0)),
                      pl.BlockSpec((None, 1, T), lambda b, L1, L2: (b, 0, 0)),
                      _wspec(conv_w.shape), _wspec(conv_b.shape)]
                     + [_wspec(w.shape) for w in ws]
                     + [_wspec(mel_w.shape), _wspec(mel_b.shape)],
            out_specs=pl.BlockSpec((None, T_mel, MELP),
                                   lambda b, L1, L2: (b, 0, 0))),
        compiler_params=pltpu.CompilerParams(
            dimension_semantics=("parallel",)),
    )(input_lengths, mel_lengths, rep_idx, x, pitch_row,
      conv_w, conv_b, *ws, mel_w, mel_b)


# ----------------------------------------------------------------------------
# Forward pass (JAX glue orchestrating the 3 fused Pallas kernels)
# ----------------------------------------------------------------------------

def acoustic_forward(kp, tokens, accents, speaker_ids, role_ids,
                     input_lengths, durations, pitch_tgt_tok, rep_idx,
                     num_frames, mel_dim):
    B, T = tokens.shape
    input_lengths = input_lengths.astype(jnp.int32)

    tok_emb = kp["embedding"][tokens]                   # (B, T, D)
    pe = kp["pe"][:T]                                   # (T, D)
    acc_emb = kp["accent"][accents]                     # (B, T, D)
    spk = kp["speaker"][speaker_ids][:, None, :]        # (B, 1, D)
    role = kp["role"][role_ids][:, None, :]             # (B, 1, D)

    # embed add + mask + encoder layer fused in one kernel (bf16 output)
    x = encoder_fuse(input_lengths, tok_emb, pe, acc_emb, spk, role,
                     kp["encoder"])

    preds = temporal_predictors(input_lengths, x, kp["predictors"])
    log_dur_pred, pitch_pred = preds[0], preds[1]

    dur_tgt = durations
    mel_lengths = jnp.sum(jnp.round(durations), axis=1).astype(jnp.int32)
    pitch_tgt = jnp.log(pitch_tgt_tok + 1.0)            # (B, T)

    # x*mask + _repeat_tensor + pitch Conv1d + decoder + mel_linear fused
    mel_p = decoder_fuse(input_lengths, mel_lengths, rep_idx, x,
                         pitch_tgt[:, None, :], kp["conv_w"], kp["conv_b"],
                         kp["decoder"], kp["mel_w"], kp["mel_b"])
    mel = mel_p[:, :num_frames, :mel_dim]               # strip lane/frame pad

    # (x, log_dur_pred, pitch_pred, attn_logprob, attn_soft, attn_hard,
    #  dur_tgt, pitch_tgt)
    return (mel, log_dur_pred, pitch_pred, None, None, None,
            dur_tgt, pitch_tgt)


# ----------------------------------------------------------------------------
# Deterministic parameter init + kernel-ready prep + host-side helpers
# ----------------------------------------------------------------------------

def sinusoidal_pe(T, D):
    pos = np.arange(T)[:, None].astype(np.float32)
    i = np.arange(D)[None, :].astype(np.float32)
    angle = pos / np.power(10000.0, (2.0 * np.floor(i / 2.0)) / D)
    pe = np.zeros((T, D), np.float32)
    pe[:, 0::2] = np.sin(angle[:, 0::2])
    pe[:, 1::2] = np.cos(angle[:, 1::2])
    return pe


def init_layer(key, D, H):
    ks = jax.random.split(key, 4)
    w = lambda k, s: jax.random.normal(k, s, jnp.float32) * 0.02
    return dict(
        wqkv=w(ks[0], (D, 3 * D)), bqkv=jnp.zeros((1, 3 * D), jnp.float32),
        wo=w(ks[1], (D, D)),       bo=jnp.zeros((1, D), jnp.float32),
        g1=jnp.ones((1, D), jnp.float32), b1=jnp.zeros((1, D), jnp.float32),
        w1=w(ks[2], (D, H)),       bf1=jnp.zeros((1, H), jnp.float32),
        w2=w(ks[3], (H, D)),       bf2=jnp.zeros((1, D), jnp.float32),
        g2=jnp.ones((1, D), jnp.float32), b2=jnp.zeros((1, D), jnp.float32),
    )


def init_params(key, vocab, D, H, K, mel_dim, num_speakers, num_roles, T_max):
    ks = jax.random.split(key, 12)
    w = lambda k, s: jax.random.normal(k, s, jnp.float32) * 0.02
    dur_est = dict(init_layer(ks[6], D, H),
                   wfin=w(ks[7], (1, D)), bfin=jnp.zeros((1, 1), jnp.float32))
    pitch_est = dict(init_layer(ks[8], D, H),
                     wfin=w(ks[9], (1, D)), bfin=jnp.zeros((1, 1), jnp.float32))
    return dict(
        embedding=w(ks[0], (vocab, D)),
        accent=w(ks[1], (2, D)),
        speaker=w(ks[2], (num_speakers + 1, D)),
        role=w(ks[3], (num_roles + 1, D)),
        pe=jnp.asarray(sinusoidal_pe(T_max, D)),
        encoder=init_layer(ks[4], D, H),
        decoder=init_layer(ks[5], D, H),
        predictors={k: jnp.stack([dur_est[k], pitch_est[k]], axis=0)
                    for k in dur_est},
        conv_w=w(ks[10], (K, D)),                # Conv1d weight (D,1,K)->(K,D)
        conv_b=jnp.zeros((1, D), jnp.float32),
        mel_w=w(ks[11], (D, mel_dim)),
        mel_b=jnp.zeros((1, mel_dim), jnp.float32),
    )


def _prep_layer(lp, D):
    """Cast MXU weights to bf16; fold 1/sqrt(D) into the Q columns."""
    scale = float(1.0 / np.sqrt(D))
    sfold = jnp.concatenate([jnp.full((D,), scale, jnp.float32),
                             jnp.ones((2 * D,), jnp.float32)])
    out = dict(lp)
    out["wqkv"] = (lp["wqkv"] * sfold).astype(jnp.bfloat16)
    out["bqkv"] = lp["bqkv"] * sfold
    out["wo"] = lp["wo"].astype(jnp.bfloat16)
    out["w1"] = lp["w1"].astype(jnp.bfloat16)
    out["w2"] = lp["w2"].astype(jnp.bfloat16)
    return out


def prepare_params(p):
    """One-time parameter prep: bf16 weights, scale folding, 128-lane mel pad."""
    D, mel_dim = p["mel_w"].shape
    melp = ((mel_dim + 127) // 128) * 128
    mel_w = jnp.zeros((D, melp), jnp.float32).at[:, :mel_dim].set(p["mel_w"])
    mel_b = jnp.zeros((1, melp), jnp.float32).at[:, :mel_dim].set(p["mel_b"])
    kp = dict(p)
    kp["encoder"] = _prep_layer(p["encoder"], D)
    kp["decoder"] = _prep_layer(p["decoder"], D)
    kp["predictors"] = _prep_layer(p["predictors"], D)
    kp["mel_w"] = mel_w.astype(jnp.bfloat16)
    kp["mel_b"] = mel_b
    return kp


# TODO(synk): _repeat_tensor has a data-dependent output length (pad_sequence);
# the token->frame index plan is computed host-side, -1 marks padded frames.
def repeat_indices(durations_np, pad_multiple=8):
    B, T = durations_np.shape
    dur = np.round(durations_np).astype(np.int64)
    n_frames = int(dur.sum(axis=1).max())
    t_mel = max(pad_multiple,
                int(np.ceil(n_frames / pad_multiple)) * pad_multiple)
    idx = np.full((B, t_mel), -1, dtype=np.int32)
    for b in range(B):
        cur = 0
        for t in range(T):
            d = int(dur[b, t])
            idx[b, cur:cur + d] = t
            cur += d
    return idx.reshape(B, t_mel, 1), n_frames


# TODO(synk): _average_pitch's phone-boundary grouping requires text_processor
# symbol tables (host Python); simplified to per-token nonzero-mean averaging.
def average_pitch_simple(pitch_np, durations_np, input_lengths, T):
    B = pitch_np.shape[0]
    out = np.zeros((B, T), dtype=np.float32)
    for b in range(B):
        cum = np.cumsum(np.concatenate([[0], durations_np[b]])).astype(int)
        for t in range(int(input_lengths[b])):
            seg = pitch_np[b, cum[t]:cum[t + 1]]
            seg = seg[seg != 0.0]
            out[b, t] = float(seg.mean()) if seg.size else 0.0
    return out


# ----------------------------------------------------------------------------

if __name__ == "__main__":
    B, T, D, H, K = 2, 16, 128, 256, 3
    mel_dim, vocab, num_speakers, num_roles = 80, 40, 4, 2

    root = jax.random.PRNGKey(0)
    k_par, k_tok, k_acc, k_dur, k_pitch = jax.random.split(root, 5)

    params = prepare_params(init_params(k_par, vocab, D, H, K, mel_dim,
                                        num_speakers, num_roles, T_max=T))

    tokens = jax.random.randint(k_tok, (B, T), 0, vocab, dtype=jnp.int32)
    accents = jax.random.randint(k_acc, (B, T), 0, 2, dtype=jnp.int32)
    speaker_ids = jnp.array([1, 3], dtype=jnp.int32)
    role_ids = jnp.array([0, 2], dtype=jnp.int32)
    input_lengths_np = np.array([16, 12], dtype=np.int32)

    # integer durations (so torch.round is identity), zero on padded tokens
    dur_np = np.array(jax.random.randint(k_dur, (B, T), 1, 4)).astype(np.float32)
    for b in range(B):
        dur_np[b, input_lengths_np[b]:] = 0.0
    mel_lengths_np = dur_np.sum(axis=1).astype(np.int32)
    n_frames = int(mel_lengths_np.max())

    # frame-level pitch with some unvoiced (zero) frames
    pitch_np = np.array(jax.random.uniform(k_pitch, (B, n_frames),
                                           minval=80.0, maxval=300.0),
                        dtype=np.float32)
    pitch_np[:, ::5] = 0.0
    for b in range(B):
        pitch_np[b, mel_lengths_np[b]:] = 0.0

    pitch_tgt_tok = jnp.asarray(
        average_pitch_simple(pitch_np, dur_np, input_lengths_np, T))
    rep_idx_np, n_frames2 = repeat_indices(dur_np)
    assert n_frames2 == n_frames

    outs = acoustic_forward(
        params, tokens, accents, speaker_ids, role_ids,
        jnp.asarray(input_lengths_np), jnp.asarray(dur_np),
        pitch_tgt_tok, jnp.asarray(rep_idx_np), n_frames, mel_dim)

    mel_out, log_dur_pred, pitch_pred = outs[0], outs[1], outs[2]
    jax.block_until_ready(mel_out)
    jax.block_until_ready(log_dur_pred)
    jax.block_until_ready(pitch_pred)
    assert mel_out.shape == (B, n_frames, mel_dim)
    assert log_dur_pred.shape == (B, T)
    assert pitch_pred.shape == (B, T)
    assert np.all(np.isfinite(np.asarray(mel_out)))
    print("KERNEL_OK")
</pallas_src>

<mosaic_0001>
module attributes {stable_mosaic.version = 11 : i64} {
  func.func @_encoder_kernel(%arg0: i32, %arg1: memref<2xi32, #tpu.memory_space<smem>>, %arg2: memref<1x16x128xf32, #tpu.memory_space<vmem>>, %arg3: memref<16x128xf32, #tpu.memory_space<vmem>>, %arg4: memref<1x16x128xf32, #tpu.memory_space<vmem>>, %arg5: memref<1x1x128xf32, #tpu.memory_space<vmem>>, %arg6: memref<1x1x128xf32, #tpu.memory_space<vmem>>, %arg7: memref<128x384xbf16, #tpu.memory_space<vmem>>, %arg8: memref<1x384xf32, #tpu.memory_space<vmem>>, %arg9: memref<128x128xbf16, #tpu.memory_space<vmem>>, %arg10: memref<1x128xf32, #tpu.memory_space<vmem>>, %arg11: memref<1x128xf32, #tpu.memory_space<vmem>>, %arg12: memref<1x128xf32, #tpu.memory_space<vmem>>, %arg13: memref<128x256xbf16, #tpu.memory_space<vmem>>, %arg14: memref<1x256xf32, #tpu.memory_space<vmem>>, %arg15: memref<256x128xbf16, #tpu.memory_space<vmem>>, %arg16: memref<1x128xf32, #tpu.memory_space<vmem>>, %arg17: memref<1x128xf32, #tpu.memory_space<vmem>>, %arg18: memref<1x128xf32, #tpu.memory_space<vmem>>, %arg19: memref<1x16x128xbf16, #tpu.memory_space<vmem>>) attributes {dimension_semantics = [#tpu.dimension_semantics<parallel>], iteration_bounds = array<i64: 2>, scalar_prefetch = 1 : i64, scratch_operands = 0 : i64, tpu.core_type = #tpu.core_type<tc>, window_params = [{transform_indices = @transform_0, window_bounds = array<i64: 1, 16, 128>}, {pipeline_mode = #tpu.pipeline_mode<synchronous>, transform_indices = @transform_1, window_bounds = array<i64: 16, 128>}, {transform_indices = @transform_2, window_bounds = array<i64: 1, 16, 128>}, {transform_indices = @transform_3, window_bounds = array<i64: 1, 1, 128>}, {transform_indices = @transform_4, window_bounds = array<i64: 1, 1, 128>}, {pipeline_mode = #tpu.pipeline_mode<synchronous>, transform_indices = @transform_5, window_bounds = array<i64: 128, 384>}, {pipeline_mode = #tpu.pipeline_mode<synchronous>, transform_indices = @transform_6, window_bounds = array<i64: 1, 384>}, {pipeline_mode = #tpu.pipeline_mode<synchronous>, transform_indices = @transform_7, window_bounds = array<i64: 128, 128>}, {pipeline_mode = #tpu.pipeline_mode<synchronous>, transform_indices = @transform_8, window_bounds = array<i64: 1, 128>}, {pipeline_mode = #tpu.pipeline_mode<synchronous>, transform_indices = @transform_9, window_bounds = array<i64: 1, 128>}, {pipeline_mode = #tpu.pipeline_mode<synchronous>, transform_indices = @transform_10, window_bounds = array<i64: 1, 128>}, {pipeline_mode = #tpu.pipeline_mode<synchronous>, transform_indices = @transform_11, window_bounds = array<i64: 128, 256>}, {pipeline_mode = #tpu.pipeline_mode<synchronous>, transform_indices = @transform_12, window_bounds = array<i64: 1, 256>}, {pipeline_mode = #tpu.pipeline_mode<synchronous>, transform_indices = @transform_13, window_bounds = array<i64: 256, 128>}, {pipeline_mode = #tpu.pipeline_mode<synchronous>, transform_indices = @transform_14, window_bounds = array<i64: 1, 128>}, {pipeline_mode = #tpu.pipeline_mode<synchronous>, transform_indices = @transform_15, window_bounds = array<i64: 1, 128>}, {pipeline_mode = #tpu.pipeline_mode<synchronous>, transform_indices = @transform_16, window_bounds = array<i64: 1, 128>}, {transform_indices = @transform_17, window_bounds = array<i64: 1, 16, 128>}]} {
    %0 = arith.index_cast %arg0 : i32 to index
    %1 = memref.load %arg1[%0] : memref<2xi32, #tpu.memory_space<smem>>
    %c0 = arith.constant 0 : index
    %c0_0 = arith.constant 0 : index
    %c0_1 = arith.constant 0 : index
    %2 = vector.load %arg2[%c0, %c0_0, %c0_1] : memref<1x16x128xf32, #tpu.memory_space<vmem>>, vector<1x16x128xf32>
    %3 = vector.shape_cast %2 : vector<1x16x128xf32> to vector<16x128xf32>
    %c0_2 = arith.constant 0 : index
    %c0_3 = arith.constant 0 : index
    %4 = vector.load %arg3[%c0_2, %c0_3] : memref<16x128xf32, #tpu.memory_space<vmem>>, vector<16x128xf32>
    %5 = arith.addf %3, %4 : vector<16x128xf32>
    %c0_4 = arith.constant 0 : index
    %c0_5 = arith.constant 0 : index
    %c0_6 = arith.constant 0 : index
    %6 = vector.load %arg4[%c0_4, %c0_5, %c0_6] : memref<1x16x128xf32, #tpu.memory_space<vmem>>, vector<1x16x128xf32>
    %7 = vector.shape_cast %6 : vector<1x16x128xf32> to vector<16x128xf32>
    %8 = arith.addf %5, %7 : vector<16x128xf32>
    %c0_7 = arith.constant 0 : index
    %c0_8 = arith.constant 0 : index
    %c0_9 = arith.constant 0 : index
    %9 = vector.load %arg5[%c0_7, %c0_8, %c0_9] : memref<1x1x128xf32, #tpu.memory_space<vmem>>, vector<1x1x128xf32>
    %10 = vector.shape_cast %9 : vector<1x1x128xf32> to vector<1x128xf32>
    %11 = vector.broadcast %10 : vector<1x128xf32> to vector<16x128xf32>
    %12 = arith.addf %8, %11 : vector<16x128xf32>
    %c0_10 = arith.constant 0 : index
    %c0_11 = arith.constant 0 : index
    %c0_12 = arith.constant 0 : index
    %13 = vector.load %arg6[%c0_10, %c0_11, %c0_12] : memref<1x1x128xf32, #tpu.memory_space<vmem>>, vector<1x1x128xf32>
    %14 = vector.shape_cast %13 : vector<1x1x128xf32> to vector<1x128xf32>
    %15 = vector.broadcast %14 : vector<1x128xf32> to vector<16x128xf32>
    %16 = arith.addf %12, %15 : vector<16x128xf32>
    %17 = tpu.iota {dimensions = array<i32: 0>} : vector<16x1xi32>
    %18 = vector.broadcast %1 : i32 to vector<16x1xi32>
    %19 = arith.cmpi slt, %17, %18 : vector<16x1xi32>
    %20 = arith.extui %19 : vector<16x1xi1> to vector<16x1xi32>
    %21 = arith.sitofp %20 : vector<16x1xi32> to vector<16x1xf32>
    %22 = vector.broadcast %21 : vector<16x1xf32> to vector<16x128xf32>
    %23 = arith.mulf %16, %22 : vector<16x128xf32>
    %24 = tpu.iota {dimensions = array<i32: 1>} : vector<1x16xi32>
    %25 = vector.broadcast %1 : i32 to vector<1x16xi32>
    %26 = arith.cmpi slt, %24, %25 : vector<1x16xi32>
    %cst = arith.constant 0.000000e+00 : f32
    %cst_13 = arith.constant -1.000000e+09 : f32
    %27 = vector.broadcast %cst : f32 to vector<1x16xf32>
    %28 = vector.broadcast %cst_13 : f32 to vector<1x16xf32>
    %29 = arith.select %26, %27, %28 : vector<1x16xi1>, vector<1x16xf32>
    %c0_14 = arith.constant 0 : index
    %c0_15 = arith.constant 0 : index
    %30 = vector.load %arg7[%c0_14, %c0_15] : memref<128x384xbf16, #tpu.memory_space<vmem>>, vector<128x384xbf16>
    %c0_16 = arith.constant 0 : index
    %c0_17 = arith.constant 0 : index
    %31 = vector.load %arg8[%c0_16, %c0_17] : memref<1x384xf32, #tpu.memory_space<vmem>>, vector<1x384xf32>
    %c0_18 = arith.constant 0 : index
    %c0_19 = arith.constant 0 : index
    %32 = vector.load %arg9[%c0_18, %c0_19] : memref<128x128xbf16, #tpu.memory_space<vmem>>, vector<128x128xbf16>
    %c0_20 = arith.constant 0 : index
    %c0_21 = arith.constant 0 : index
    %33 = vector.load %arg10[%c0_20, %c0_21] : memref<1x128xf32, #tpu.memory_space<vmem>>, vector<1x128xf32>
    %c0_22 = arith.constant 0 : index
    %c0_23 = arith.constant 0 : index
    %34 = vector.load %arg11[%c0_22, %c0_23] : memref<1x128xf32, #tpu.memory_space<vmem>>, vector<1x128xf32>
    %c0_24 = arith.constant 0 : index
    %c0_25 = arith.constant 0 : index
    %35 = vector.load %arg12[%c0_24, %c0_25] : memref<1x128xf32, #tpu.memory_space<vmem>>, vector<1x128xf32>
    %c0_26 = arith.constant 0 : index
    %c0_27 = arith.constant 0 : index
    %36 = vector.load %arg13[%c0_26, %c0_27] : memref<128x256xbf16, #tpu.memory_space<vmem>>, vector<128x256xbf16>
    %c0_28 = arith.constant 0 : index
    %c0_29 = arith.constant 0 : index
    %37 = vector.load %arg14[%c0_28, %c0_29] : memref<1x256xf32, #tpu.memory_space<vmem>>, vector<1x256xf32>
    %c0_30 = arith.constant 0 : index
    %c0_31 = arith.constant 0 : index
    %38 = vector.load %arg15[%c0_30, %c0_31] : memref<256x128xbf16, #tpu.memory_space<vmem>>, vector<256x128xbf16>
    %c0_32 = arith.constant 0 : index
    %c0_33 = arith.constant 0 : index
    %39 = vector.load %arg16[%c0_32, %c0_33] : memref<1x128xf32, #tpu.memory_space<vmem>>, vector<1x128xf32>
    %c0_34 = arith.constant 0 : index
    %c0_35 = arith.constant 0 : index
    %40 = vector.load %arg17[%c0_34, %c0_35] : memref<1x128xf32, #tpu.memory_space<vmem>>, vector<1x128xf32>
    %c0_36 = arith.constant 0 : index
    %c0_37 = arith.constant 0 : index
    %41 = vector.load %arg18[%c0_36, %c0_37] : memref<1x128xf32, #tpu.memory_space<vmem>>, vector<1x128xf32>
    %42 = arith.truncf %23 : vector<16x128xf32> to vector<16x128xbf16>
    %cst_38 = arith.constant dense<0.000000e+00> : vector<16x384xf32>
    %43 = tpu.matmul %42, %30, %cst_38 {dimension_numbers = #tpu.dot_dimension_numbers<[1], [0], [0], [1], [0, 0, 1, 1], [], []>} : vector<16x128xbf16>, vector<128x384xbf16>, vector<16x384xf32> -> vector<16x384xf32>
    %44 = vector.broadcast %31 : vector<1x384xf32> to vector<16x384xf32>
    %45 = arith.addf %43, %44 : vector<16x384xf32>
    %46 = vector.extract_strided_slice %45 {offsets = [0, 0], sizes = [16, 128], strides = [1, 1]} : vector<16x384xf32> to vector<16x128xf32>
    %47 = arith.truncf %46 : vector<16x128xf32> to vector<16x128xbf16>
    %48 = vector.extract_strided_slice %45 {offsets = [0, 128], sizes = [16, 128], strides = [1, 1]} : vector<16x384xf32> to vector<16x128xf32>
    %49 = arith.truncf %48 : vector<16x128xf32> to vector<16x128xbf16>
    %50 = vector.extract_strided_slice %45 {offsets = [0, 256], sizes = [16, 128], strides = [1, 1]} : vector<16x384xf32> to vector<16x128xf32>
    %51 = arith.truncf %50 : vector<16x128xf32> to vector<16x128xbf16>
    %cst_39 = arith.constant dense<0.000000e+00> : vector<16x16xf32>
    %52 = tpu.matmul %47, %49, %cst_39 {dimension_numbers = #tpu.dot_dimension_numbers<[1], [1], [0], [0], [0, 0, 1, 0], [], []>} : vector<16x128xbf16>, vector<16x128xbf16>, vector<16x16xf32> -> vector<16x16xf32>
    %53 = vector.broadcast %29 : vector<1x16xf32> to vector<16x16xf32>
    %54 = arith.addf %52, %53 : vector<16x16xf32>
    %cst_40 = arith.constant dense<0xFF800000> : vector<16xf32>
    %55 = vector.multi_reduction <maximumf>, %54, %cst_40 [1] : vector<16x16xf32> to vector<16xf32>
    %56 = vector.shape_cast %55 : vector<16xf32> to vector<16x1xf32>
    %57 = vector.broadcast %56 : vector<16x1xf32> to vector<16x16xf32>
    %58 = arith.subf %54, %57 : vector<16x16xf32>
    %59 = math.exp %58 : vector<16x16xf32>
    %cst_41 = arith.constant dense<0.000000e+00> : vector<16xf32>
    %60 = vector.multi_reduction <add>, %59, %cst_41 [1] : vector<16x16xf32> to vector<16xf32>
    %61 = vector.shape_cast %60 : vector<16xf32> to vector<16x1xf32>
    %62 = tpu.reciprocal %61 {approx = true} : vector<16x1xf32> -> vector<16x1xf32>
    %63 = vector.broadcast %62 : vector<16x1xf32> to vector<16x16xf32>
    %64 = arith.mulf %59, %63 : vector<16x16xf32>
    %65 = arith.truncf %64 : vector<16x16xf32> to vector<16x16xbf16>
    %cst_42 = arith.constant dense<0.000000e+00> : vector<16x128xf32>
    %66 = tpu.matmul %65, %51, %cst_42 {dimension_numbers = #tpu.dot_dimension_numbers<[1], [0], [0], [1], [0, 0, 1, 1], [], []>} : vector<16x16xbf16>, vector<16x128xbf16>, vector<16x128xf32> -> vector<16x128xf32>
    %67 = arith.truncf %66 : vector<16x128xf32> to vector<16x128xbf16>
    %cst_43 = arith.constant dense<0.000000e+00> : vector<16x128xf32>
    %68 = tpu.matmul %67, %32, %cst_43 {dimension_numbers = #tpu.dot_dimension_numbers<[1], [0], [0], [1], [0, 0, 1, 1], [], []>} : vector<16x128xbf16>, vector<128x128xbf16>, vector<16x128xf32> -> vector<16x128xf32>
    %69 = vector.broadcast %33 : vector<1x128xf32> to vector<16x128xf32>
    %70 = arith.addf %68, %69 : vector<16x128xf32>
    %71 = arith.addf %70, %23 : vector<16x128xf32>
    %cst_44 = arith.constant dense<0.000000e+00> : vector<16xf32>
    %72 = vector.multi_reduction <add>, %71, %cst_44 [1] : vector<16x128xf32> to vector<16xf32>
    %73 = vector.shape_cast %72 : vector<16xf32> to vector<16x1xf32>
    %cst_45 = arith.constant 1.280000e+02 : f32
    %74 = vector.broadcast %cst_45 : f32 to vector<16x1xf32>
    %75 = arith.divf %73, %74 : vector<16x1xf32>
    %76 = vector.broadcast %75 : vector<16x1xf32> to vector<16x128xf32>
    %77 = arith.subf %71, %76 : vector<16x128xf32>
    %78 = arith.mulf %77, %77 : vector<16x128xf32>
    %cst_46 = arith.constant dense<0.000000e+00> : vector<16xf32>
    %79 = vector.multi_reduction <add>, %78, %cst_46 [1] : vector<16x128xf32> to vector<16xf32>
    %80 = vector.shape_cast %79 : vector<16xf32> to vector<16x1xf32>
    %cst_47 = arith.constant 1.280000e+02 : f32
    %81 = vector.broadcast %cst_47 : f32 to vector<16x1xf32>
    %82 = arith.divf %80, %81 : vector<16x1xf32>
    %83 = vector.broadcast %75 : vector<16x1xf32> to vector<16x128xf32>
    %84 = arith.subf %71, %83 : vector<16x128xf32>
    %cst_48 = arith.constant 9.99999974E-6 : f32
    %85 = vector.broadcast %cst_48 : f32 to vector<16x1xf32>
    %86 = arith.addf %82, %85 : vector<16x1xf32>
    %87 = math.rsqrt %86 : vector<16x1xf32>
    %88 = vector.broadcast %87 : vector<16x1xf32> to vector<16x128xf32>
    %89 = arith.mulf %84, %88 : vector<16x128xf32>
    %90 = vector.broadcast %34 : vector<1x128xf32> to vector<16x128xf32>
    %91 = arith.mulf %89, %90 : vector<16x128xf32>
    %92 = vector.broadcast %35 : vector<1x128xf32> to vector<16x128xf32>
    %93 = arith.addf %91, %92 : vector<16x128xf32>
    %94 = arith.truncf %93 : vector<16x128xf32> to vector<16x128xbf16>
    %cst_49 = arith.constant dense<0.000000e+00> : vector<16x256xf32>
    %95 = tpu.matmul %94, %36, %cst_49 {dimension_numbers = #tpu.dot_dimension_numbers<[1], [0], [0], [1], [0, 0, 1, 1], [], []>} : vector<16x128xbf16>, vector<128x256xbf16>, vector<16x256xf32> -> vector<16x256xf32>
    %96 = vector.broadcast %37 : vector<1x256xf32> to vector<16x256xf32>
    %97 = arith.addf %95, %96 : vector<16x256xf32>
    %cst_50 = arith.constant 0.000000e+00 : f32
    %98 = vector.broadcast %cst_50 : f32 to vector<16x256xf32>
    %99 = arith.maximumf %97, %98 : vector<16x256xf32>
    %100 = arith.truncf %99 : vector<16x256xf32> to vector<16x256xbf16>
    %cst_51 = arith.constant dense<0.000000e+00> : vector<16x128xf32>
    %101 = tpu.matmul %100, %38, %cst_51 {dimension_numbers = #tpu.dot_dimension_numbers<[1], [0], [0], [1], [0, 0, 1, 1], [], []>} : vector<16x256xbf16>, vector<256x128xbf16>, vector<16x128xf32> -> vector<16x128xf32>
    %102 = vector.broadcast %39 : vector<1x128xf32> to vector<16x128xf32>
    %103 = arith.addf %101, %102 : vector<16x128xf32>
    %104 = arith.addf %103, %93 : vector<16x128xf32>
    %cst_52 = arith.constant dense<0.000000e+00> : vector<16xf32>
    %105 = vector.multi_reduction <add>, %104, %cst_52 [1] : vector<16x128xf32> to vector<16xf32>
    %106 = vector.shape_cast %105 : vector<16xf32> to vector<16x1xf32>
    %cst_53 = arith.constant 1.280000e+02 : f32
    %107 = vector.broadcast %cst_53 : f32 to vector<16x1xf32>
    %108 = arith.divf %106, %107 : vector<16x1xf32>
    %109 = vector.broadcast %108 : vector<16x1xf32> to vector<16x128xf32>
    %110 = arith.subf %104, %109 : vector<16x128xf32>
    %111 = arith.mulf %110, %110 : vector<16x128xf32>
    %cst_54 = arith.constant dense<0.000000e+00> : vector<16xf32>
    %112 = vector.multi_reduction <add>, %111, %cst_54 [1] : vector<16x128xf32> to vector<16xf32>
    %113 = vector.shape_cast %112 : vector<16xf32> to vector<16x1xf32>
    %cst_55 = arith.constant 1.280000e+02 : f32
    %114 = vector.broadcast %cst_55 : f32 to vector<16x1xf32>
    %115 = arith.divf %113, %114 : vector<16x1xf32>
    %116 = vector.broadcast %108 : vector<16x1xf32> to vector<16x128xf32>
    %117 = arith.subf %104, %116 : vector<16x128xf32>
    %cst_56 = arith.constant 9.99999974E-6 : f32
    %118 = vector.broadcast %cst_56 : f32 to vector<16x1xf32>
    %119 = arith.addf %115, %118 : vector<16x1xf32>
    %120 = math.rsqrt %119 : vector<16x1xf32>
    %121 = vector.broadcast %120 : vector<16x1xf32> to vector<16x128xf32>
    %122 = arith.mulf %117, %121 : vector<16x128xf32>
    %123 = vector.broadcast %40 : vector<1x128xf32> to vector<16x128xf32>
    %124 = arith.mulf %122, %123 : vector<16x128xf32>
    %125 = vector.broadcast %41 : vector<1x128xf32> to vector<16x128xf32>
    %126 = arith.addf %124, %125 : vector<16x128xf32>
    %127 = arith.truncf %126 : vector<16x128xf32> to vector<16x128xbf16>
    %c0_57 = arith.constant 0 : index
    %c0_58 = arith.constant 0 : index
    %c0_59 = arith.constant 0 : index
    %128 = vector.load %arg19[%c0_57, %c0_58, %c0_59] : memref<1x16x128xbf16, #tpu.memory_space<vmem>>, vector<1x16x128xbf16>
    %129 = vector.shape_cast %128 : vector<1x16x128xbf16> to vector<16x128xbf16>
    %130 = vector.shape_cast %127 : vector<16x128xbf16> to vector<1x16x128xbf16>
    tpu.vector_store %arg19[%c0_57, %c0_58, %c0_59], %130 {strides = array<i32>} : memref<1x16x128xbf16, #tpu.memory_space<vmem>>, vector<1x16x128xbf16>,
    return
  }
  func.func @transform_0(%arg0: i32, %arg1: memref<2xi32, #tpu.memory_space<smem>>) -> (i32, i32, i32) {
    %c0_i32 = arith.constant 0 : i32
    %c0_i32_0 = arith.constant 0 : i32
    %c0_i32_1 = arith.constant 0 : i32
    return %arg0, %c0_i32, %c0_i32_0 : i32, i32, i32
  }
  func.func @transform_1(%arg0: i32, %arg1: memref<2xi32, #tpu.memory_space<smem>>) -> (i32, i32) {
    %c0_i32 = arith.constant 0 : i32
    %c0_i32_0 = arith.constant 0 : i32
    %c0_i32_1 = arith.constant 0 : i32
    return %c0_i32, %c0_i32_0 : i32, i32
  }
  func.func @transform_2(%arg0: i32, %arg1: memref<2xi32, #tpu.memory_space<smem>>) -> (i32, i32, i32) {
    %c0_i32 = arith.constant 0 : i32
    %c0_i32_0 = arith.constant 0 : i32
    %c0_i32_1 = arith.constant 0 : i32
    return %arg0, %c0_i32, %c0_i32_0 : i32, i32, i32
  }
  func.func @transform_3(%arg0: i32, %arg1: memref<2xi32, #tpu.memory_space<smem>>) -> (i32, i32, i32) {
    %c0_i32 = arith.constant 0 : i32
    %c0_i32_0 = arith.constant 0 : i32
    %c0_i32_1 = arith.constant 0 : i32
    return %arg0, %c0_i32, %c0_i32_0 : i32, i32, i32
  }
  func.func @transform_4(%arg0: i32, %arg1: memref<2xi32, #tpu.memory_space<smem>>) -> (i32, i32, i32) {
    %c0_i32 = arith.constant 0 : i32
    %c0_i32_0 = arith.constant 0 : i32
    %c0_i32_1 = arith.constant 0 : i32
    return %arg0, %c0_i32, %c0_i32_0 : i32, i32, i32
  }
  func.func @transform_5(%arg0: i32, %arg1: memref<2xi32, #tpu.memory_space<smem>>) -> (i32, i32) {
    %c0_i32 = arith.constant 0 : i32
    %c0_i32_0 = arith.constant 0 : i32
    %c0_i32_1 = arith.constant 0 : i32
    return %c0_i32, %c0_i32_0 : i32, i32
  }
  func.func @transform_6(%arg0: i32, %arg1: memref<2xi32, #tpu.memory_space<smem>>) -> (i32, i32) {
    %c0_i32 = arith.constant 0 : i32
    %c0_i32_0 = arith.constant 0 : i32
    %c0_i32_1 = arith.constant 0 : i32
    return %c0_i32, %c0_i32_0 : i32, i32
  }
  func.func @transform_7(%arg0: i32, %arg1: memref<2xi32, #tpu.memory_space<smem>>) -> (i32, i32) {
    %c0_i32 = arith.constant 0 : i32
    %c0_i32_0 = arith.constant 0 : i32
    %c0_i32_1 = arith.constant 0 : i32
    return %c0_i32, %c0_i32_0 : i32, i32
  }
  func.func @transform_8(%arg0: i32, %arg1: memref<2xi32, #tpu.memory_space<smem>>) -> (i32, i32) {
    %c0_i32 = arith.constant 0 : i32
    %c0_i32_0 = arith.constant 0 : i32
    %c0_i32_1 = arith.constant 0 : i32
    return %c0_i32, %c0_i32_0 : i32, i32
  }
  func.func @transform_9(%arg0: i32, %arg1: memref<2xi32, #tpu.memory_space<smem>>) -> (i32, i32) {
    %c0_i32 = arith.constant 0 : i32
    %c0_i32_0 = arith.constant 0 : i32
    %c0_i32_1 = arith.constant 0 : i32
    return %c0_i32, %c0_i32_0 : i32, i32
  }
  func.func @transform_10(%arg0: i32, %arg1: memref<2xi32, #tpu.memory_space<smem>>) -> (i32, i32) {
    %c0_i32 = arith.constant 0 : i32
    %c0_i32_0 = arith.constant 0 : i32
    %c0_i32_1 = arith.constant 0 : i32
    return %c0_i32, %c0_i32_0 : i32, i32
  }
  func.func @transform_11(%arg0: i32, %arg1: memref<2xi32, #tpu.memory_space<smem>>) -> (i32, i32) {
    %c0_i32 = arith.constant 0 : i32
    %c0_i32_0 = arith.constant 0 : i32
    %c0_i32_1 = arith.constant 0 : i32
    return %c0_i32, %c0_i32_0 : i32, i32
  }
  func.func @transform_12(%arg0: i32, %arg1: memref<2xi32, #tpu.memory_space<smem>>) -> (i32, i32) {
    %c0_i32 = arith.constant 0 : i32
    %c0_i32_0 = arith.constant 0 : i32
    %c0_i32_1 = arith.constant 0 : i32
    return %c0_i32, %c0_i32_0 : i32, i32
  }
  func.func @transform_13(%arg0: i32, %arg1: memref<2xi32, #tpu.memory_space<smem>>) -> (i32, i32) {
    %c0_i32 = arith.constant 0 : i32
    %c0_i32_0 = arith.constant 0 : i32
    %c0_i32_1 = arith.constant 0 : i32
    return %c0_i32, %c0_i32_0 : i32, i32
  }
  func.func @transform_14(%arg0: i32, %arg1: memref<2xi32, #tpu.memory_space<smem>>) -> (i32, i32) {
    %c0_i32 = arith.constant 0 : i32
    %c0_i32_0 = arith.constant 0 : i32
    %c0_i32_1 = arith.constant 0 : i32
    return %c0_i32, %c0_i32_0 : i32, i32
  }
  func.func @transform_15(%arg0: i32, %arg1: memref<2xi32, #tpu.memory_space<smem>>) -> (i32, i32) {
    %c0_i32 = arith.constant 0 : i32
    %c0_i32_0 = arith.constant 0 : i32
    %c0_i32_1 = arith.constant 0 : i32
    return %c0_i32, %c0_i32_0 : i32, i32
  }
  func.func @transform_16(%arg0: i32, %arg1: memref<2xi32, #tpu.memory_space<smem>>) -> (i32, i32) {
    %c0_i32 = arith.constant 0 : i32
    %c0_i32_0 = arith.constant 0 : i32
    %c0_i32_1 = arith.constant 0 : i32
    return %c0_i32, %c0_i32_0 : i32, i32
  }
  func.func @transform_17(%arg0: i32, %arg1: memref<2xi32, #tpu.memory_space<smem>>) -> (i32, i32, i32) {
    %c0_i32 = arith.constant 0 : i32
    %c0_i32_0 = arith.constant 0 : i32
    %c0_i32_1 = arith.constant 0 : i32
    return %arg0, %c0_i32, %c0_i32_0 : i32, i32, i32
  }
}

</mosaic_0001>

<bundles_post_ra>
// kernel: tpu_custom_call.1
= control target key start
LH: loop header
LB: loop body
LE: loop exit
PB: predicated region body
PF: predicated region fallthrough
CT: control target
= control target key end

     0   :  { %s2549_s27 = smov [#allocation3]   ;;  %s3079_s0 = inlined_call_operand.hbm [shape: s32[2], index: 0, kind: input, shape index: {}]   ;;  %s3080_s1 = inlined_call_operand.hbm [shape: f32[2,16,128], index: 1, kind: input, shape index: {}]   ;;  %s3081_s2 = inlined_call_operand.hbm [shape: f32[16,128], index: 2, kind: input, shape index: {}]   ;;  %s3082_s3 = inlined_call_operand.hbm [shape: f32[2,16,128], index: 3, kind: input, shape index: {}]   ;;  %s3083_s4 = inlined_call_operand.vmem [shape: f32[2,1,128], index: 4, kind: input, shape index: {}]   ;;  %s3084_s5 = inlined_call_operand.vmem [shape: f32[2,1,128], index: 5, kind: input, shape index: {}]   ;;  %s3085_s6 = inlined_call_operand.hbm [shape: bf16[128,384], index: 6, kind: input, shape index: {}]   ;;  %s3086_s7 = inlined_call_operand.vmem [shape: f32[1,384], index: 7, kind: input, shape index: {}]   ;;  %s3087_s8 = inlined_call_operand.hbm [shape: bf16[128,128], index: 8, kind: input, shape index: {}]   ;;  %s3088_s9 = inlined_call_operand.vmem [shape: f32[1,128], index: 9, kind: input, shape index: {}]   ;;  %s3089_s10 = inlined_call_operand.vmem [shape: f32[1,128], index: 10, kind: input, shape index: {}]   ;;  %s3090_s11 = inlined_call_operand.vmem [shape: f32[1,128], index: 11, kind: input, shape index: {}]   ;;  %s3091_s12 = inlined_call_operand.hbm [shape: bf16[128,256], index: 12, kind: input, shape index: {}]   ;;  %s3092_s13 = inlined_call_operand.vmem [shape: f32[1,256], index: 13, kind: input, shape index: {}]   ;;  %s3093_s14 = inlined_call_operand.hbm [shape: bf16[256,128], index: 14, kind: input, shape index: {}]   ;;  %s3094_s15 = inlined_call_operand.vmem [shape: f32[1,128], index: 15, kind: input, shape index: {}]   ;;  %s3095_s16 = inlined_call_operand.vmem [shape: f32[1,128], index: 16, kind: input, shape index: {}]   ;;  %s3096_s17 = inlined_call_operand.vmem [shape: f32[1,128], index: 17, kind: input, shape index: {}]   ;;  %s3097_s18 = inlined_call_operand.hbm [shape: bf16[2,16,128], index: 18, kind: output, shape index: {}]  }
   0x1   :  { %3121 = sst [smem:[#allocation32_spill]] %s3079_s0 }
   0x2   :  { %3122 = sst [smem:[#allocation33_spill]] %s3080_s1 }
   0x3   :  { %3123 = sst [smem:[#allocation34_spill]] %s3081_s2 }
   0x4   :  { %3124 = sst [smem:[#allocation35_spill]] %s3087_s8 }
   0x5   :  { %3125 = sst [smem:[#allocation36_spill]] %s3089_s10 }
   0x6   :  { %3126 = sst [smem:[#allocation37_spill]] %s3090_s11 }
   0x7   :  { %3127 = sst [smem:[#allocation38_spill]] %s3092_s13 }
   0x8   :  { %3128 = sst [smem:[#allocation39_spill]] %s3094_s15 }
   0x9   :  { %3129 = sst [smem:[#allocation40_spill]] %s3095_s16 }
   0xa   :  { %3130 = sst [smem:[#allocation41_spill]] %s3096_s17 }
   0xb   :  { %3131 = sst [smem:[#allocation42_spill]] %s3097_s18 }
   0xc   :  { %s3132_s11 = sld [smem:[#allocation32_spill]] }
  0x12   :  { %24 = dma.hbm_to_smem %s3132_s11, 16, %s2549_s27, [#allocation2] }
  0x13   :  { %2503 = dma.done.wait [#allocation2], 16 }
  0x14   :  { %2504 = vsyncadd [#allocation2], 4294967280 }
  0x15   :  { %26 = sfence }
  0x16   :  { %27 = vsyncpa [#allocation5], 0 }
  0x17   :  { %29 = vsyncpa [#allocation5 + $0x1], 0 }
  0x18   :  { %30 = vsyncpa [#allocation8], 0 }
  0x19   :  { %31 = vsyncpa [#allocation12], 0 }
  0x1a   :  { %32 = vsyncpa [#allocation15], 0 }
  0x1b   :  { %33 = vsyncpa [#allocation6], 0 }
  0x1c   :  { %35 = vsyncpa [#allocation6 + $0x1], 0  ;;  %s2668_s30 = smov 0   ;;  %s2670_s0 = smov 0  }
  0x1d   :  { %s2672_s19 = smov 0   ;;  %s2674_s1 = smov 0  }
  0x1e LB: > { %3133 = sst [smem:[#allocation25_spill]] %s2535_s30  ;;  %s2550_s11 = smov [#allocation7]   ;;  %s2547_s1 = sphi %s2674_s1, %s3180_s1   ;;  %s2543_s19 = sphi %s2672_s19, %s3182_s19   ;;  %s2539_s0 = sphi %s2670_s0, %s3184_s0   ;;  %s2535_s30 = sphi %s2668_s30, %s3183_s30  }
  0x1f   : > { %3134 = sst [smem:[#allocation26_spill]] %s2543_s19  ;;  %s461_s20 = sshll.u32 %s2550_s11, 4  ;;  %s462_s20 = int_to_ptr.vmem [resolvable:$true] %s461_s20 }
  0x20   : > { %3135 = sst [smem:[#allocation27_spill]] %s2547_s1  ;;  %s2689_s21 = sadd.s32 4294967295, %s2547_s1  }
  0x21   : > { %p1846_p0 = scmp.ge.s32.totalorder %s2547_s1, 1  ;;  %p3114_p1 = scmp.eq.s32.totalorder %s2689_s21, 0 }
  0x22   : > { %p449_p2 = scmp.lt.s32.totalorder %s2547_s1, 3  ;;  %s2551_s2 = smov [#allocation11]  }
  0x23   : > { %s490_s23 = sshll.u32 %s2551_s2, 4  ;;  %s2286_s26 = scalar_lea.vmem %s462_s20, 256  ;;  %s491_s23 = int_to_ptr.vmem [resolvable:$true] %s490_s23 }
  0x24   : > { %p2694_p3 = pnand %p1846_p0, %p449_p2  ;;  %p2287_p8 = scmp.ne.s32.totalorder %s462_s20, %s2286_s26 }
  0x25   : > { %p2294_p11 = scmp.lt.s32.totalorder %s462_s20, %s462_s20  ;;  %p2295_p12 = scmp.lt.s32.totalorder %s2286_s26, %s2286_s26 }
  0x26   : > { %s3136_s22 = scalar_select %p2694_p3, 1, 0 }
  0x27   : > { %p2082_p5 = pneg %p2694_p3  ;;  %p2296_p13 = por %p2295_p12, %p2294_p11 }
  0x29   : > { %p2703_p6 = pnand %p2082_p5, %p3114_p1 }
  0x2b   : > { %s3137_s24 = scalar_select %p2703_p6, 1, 0 }
  0x2c   : > { %p2709_p7 = pneg %p2703_p6 }
  0x2e   : > { %p2289_p9 = pnand %p2287_p8, %p2709_p7 }
  0x30   : > { %p2290_p10 = pneg %p2289_p9 }
  0x32   : > { %p2297_p0 = pnand %p2296_p13, %p2290_p10 }
  0x34   : > { %2300 = shalt.err (!%p2297_p0)
}
  0x35   : > { %s3100_s27 = smov 128   ;;  %s3102_s28 = smov 8  }
  0x36   : > { %s3139_s2 = sld [smem:[#allocation34_spill]]  ;;  %s2312_s18 = scalar_lea.vmem %s491_s23, 1024 }
  0x37   : > { %p2313_p2 = scmp.ne.s32.totalorder %s491_s23, %s2312_s18  ;;  %p2320_p9 = scmp.lt.s32.totalorder %s491_s23, %s491_s23 }
  0x38   : > { %p2321_p10 = scmp.lt.s32.totalorder %s2312_s18, %s2312_s18 }
  0x39   : > { %p2315_p5 = pnand %p2313_p2, %p2709_p7 }
  0x3a   : > { %p2322_p11 = por %p2321_p10, %p2320_p9 }
  0x3b   : > { %p2316_p8 = pneg %p2315_p5 }
  0x3c   : > { %2085 = dma.hbm_to_vmem [thread:$0]  (!%p2703_p6), %s3139_s2, 256, %s462_s20, [#allocation8], %s3100_s27, %s3100_s27, %s3102_s28  }
  0x3d   : > { %p2323_p12 = pnand %p2322_p11, %p2316_p8 }
  0x3f   : > { %2326 = shalt.err (!%p2323_p12)
}
  0x40   : > { %s3104_s26 = smov 64   ;;  %s3105_s20 = smov 4  }
  0x41   : > { %s3140_s8 = sld [smem:[#allocation35_spill]]  ;;  %s1845_s11 = sadd.s32 4294967294, %s2547_s1  }
  0x42   : > { %s2735_s2 = sadd.s32 1, %s2547_s1   ;;  %s48_s28 = sadd.s32 1, %s2543_s19 }
  0x43   : > { %3141 = sst [smem:[#allocation28_spill]] %s2735_s2  ;;  %s45_s27 = ssub.s32 %s2547_s1, %s2735_s2 }
  0x44   : > { %p46_p13 = scmp.eq.s32.totalorder %s45_s27, 0  ;;  %p55_p0 = scmp.ne.s32.totalorder %s2543_s19, %s2539_s0 }
  0x45   : > { %p56_p2 = scmp.eq.s32.totalorder %s2547_s1, 0  ;;  %p61_p5 = scmp.ne.s32.totalorder %s2539_s0, %s2535_s30 }
  0x46   : > { %s2746_s17 = scalar_select %p46_p13, %s2543_s19, %s48_s28  }
  0x47   : > { %2091 = dma.hbm_to_vmem [thread:$0]  (!%p2703_p6), %s3140_s8, 1024, %s491_s23, [#allocation12], %s3104_s26, %s3104_s26, %s3105_s20  }
  0x48   : > { %3142 = sst [smem:[#allocation29_spill]] %s2746_s17  ;;  %p2748_p8 = por %p56_p2, %p55_p0 }
  0x49   : > { %p2754_p9 = por %p3114_p1, %p61_p5  ;;  %p436_p10 = scmp.eq.s32.totalorder %s2689_s21, 1 }
  0x4a   : > { %p442_p11 = scmp.eq.s32.totalorder %s1845_s11, 1  ;;  %p2114_p12 = scmp.lt.s32.totalorder %s2547_s1, 2 }
  0x4b   : > { %s3144_s23 = scalar_select %p2754_p9, 1, 0 }
  0x4c   : > { %s551_s18 = sand.u32 1, %s2547_s1   ;;  %p2761_p4 = por %p436_p10, %p55_p0 }
  0x4d   : > { %p2765_p13 = por %p442_p11, %p61_p5  ;;  %s553_s29 = sand.u32 1, %s2543_s19  }
  0x4e   : > { %s3145_s27 = scalar_select %p2761_p4, 1, 0 }
  0x4f   : > { %s3147_s28 = scalar_select %p2765_p13, 1, 0 }
  0x50   : > { %3146 = sst [smem:[#allocation30_spill]] %s3145_s27  ;;  %s2770_s26 = sshll.u32 %s553_s29, 4 }
  0x51   : > { %3148 = sst [smem:[#allocation31_spill]] %s3147_s28  ;;  %s1950_s20 = sshll.u32 %s2547_s1, 8 }
  0x52   : > { %s3149_s2 = sld [smem:[#allocation33_spill]]  ;;  %s555_s11 = scalar_lea.vmem [#allocation4], %s2770_s26 }
  0x53   : > { %s562_s15 = sshll.u32 %s555_s11, 4  ;;  %p2781_p0 = pnand %p2114_p12, %p2748_p8  ;;  %s2785_s15 = int_to_ptr.vmem [resolvable:$true] %s562_s15 }
  0x54   : > { %s2790_s8 = scalar_lea.hbm %s3082_s3, %s1950_s20  ;;  %s2792_s17 = scalar_lea.sflag [#allocation5], %s551_s18 }
  0x55   : > { %p2329_p5 = pneg %p2781_p0 }
  0x58   : > { %s2776_s30 = scalar_lea.hbm %s3149_s2, %s1950_s20  ;;  %s2332_s28 = scalar_lea.hbm %s3149_s2, 512 }
  0x59   : > { %s2327_s1 = scalar_lea.hbm %s2776_s30, 256  ;;  %p2333_p11 = scmp.lt.s32.totalorder %s2776_s30, %s3149_s2 }
  0x5a   : > { %p2328_p2 = scmp.ne.s32.totalorder %s2776_s30, %s2327_s1  ;;  %p2334_p12 = scmp.lt.s32.totalorder %s2332_s28, %s2327_s1 }
  0x5c   : > { %p2330_p8 = pnand %p2329_p5, %p2328_p2  ;;  %p2335_p1 = por %p2334_p12, %p2333_p11 }
  0x5e   : > { %p2331_p10 = pneg %p2330_p8 }
  0x60   : > { %p2336_p13 = pnand %p2335_p1, %p2331_p10 }
  0x62   : > { %2339 = shalt.err (!%p2336_p13)
}
  0x63   : > { %s2340_s19 = scalar_lea.vmem %s2785_s15, 256  ;;  %s2556_s20 = smov [#allocation4]  }
  0x64   : > { %p2341_p4 = scmp.ne.s32.totalorder %s2785_s15, %s2340_s19  ;;  %s2345_s18 = sshll.u32 %s2556_s20, 4  ;;  %s2346_s18 = int_to_ptr.vmem [resolvable:$false] %s2345_s18 }
  0x65   : > { %s2347_s29 = scalar_lea.vmem %s2346_s18, 512  ;;  %p2348_p9 = scmp.lt.s32.totalorder %s2785_s15, %s2346_s18 }
  0x66   : > { %p2343_p2 = pnand %p2341_p4, %p2329_p5  ;;  %p2349_p3 = scmp.lt.s32.totalorder %s2347_s29, %s2340_s19 }
  0x68   : > { %p2344_p8 = pneg %p2343_p2  ;;  %p2350_p6 = por %p2349_p3, %p2348_p9 }
  0x6a   : > { %p2351_p11 = pnand %p2350_p6, %p2344_p8 }
  0x6c   : > { %2354 = shalt.err (!%p2351_p11)
}
  0x6d   : > { %s3151_s10 = smov 8   ;;  %s3152_s13 = smov 128  }
  0x6e   : > { %2101 = dma.hbm_to_vmem [thread:$0]  (!%p2781_p0), %s2776_s30, 256, %s2785_s15, %s2792_s17, %s3152_s13, %s3152_s13, %s3151_s10  }
  0x6f   : > { %s576_s1 = scalar_lea.vmem [#allocation9], %s2770_s26  ;;  %s2557_s16 = smov [#allocation10]  }
  0x70   : > { %s583_s28 = sshll.u32 %s576_s1, 4  ;;  %s474_s11 = sshll.u32 %s2557_s16, 4  ;;  %s2823_s28 = int_to_ptr.vmem [resolvable:$true] %s583_s28  ;;  %s475_s11 = int_to_ptr.vmem [resolvable:$true] %s474_s11 }
  0x71   : > { %s2366_s19 = scalar_lea.vmem %s475_s11, 3072  ;;  %p2374_p6 = scmp.lt.s32.totalorder %s475_s11, %s475_s11 }
  0x72   : > { %p2367_p1 = scmp.ne.s32.totalorder %s475_s11, %s2366_s19  ;;  %p2375_p9 = scmp.lt.s32.totalorder %s2366_s19, %s2366_s19 }
  0x74   : > { %p2369_p3 = pnand %p2367_p1, %p2709_p7  ;;  %p2376_p13 = por %p2375_p9, %p2374_p6 }
  0x76   : > { %p2370_p4 = pneg %p2369_p3 }
  0x78   : > { %p2377_p10 = pnand %p2376_p13, %p2370_p4 }
  0x7a   : > { %2380 = shalt.err (!%p2377_p10)
}
  0x7b   : > { %s2558_s20 = smov 192   ;;  %s2559_s15 = smov 12  }
  0x7c   : > { %p3153_p12 = scmp.ne.s32.totalorder %s3137_s24, 0  ;;  %s2560_s18 = smov [#allocation13]  }
  0x7d   : > { %s512_s29 = sshll.u32 %s2560_s18, 4  ;;  %s2561_s1 = smov [#allocation14]   ;;  %s513_s29 = int_to_ptr.vmem [resolvable:$true] %s512_s29 }
  0x7e   : > { %2088 = dma.hbm_to_vmem [thread:$0]  (!%p3153_p12), %s3085_s6, 3072, %s475_s11, [#allocation8], %s2558_s20, %s2558_s20, %s2559_s15  }
  0x7f   : > { %s528_s16 = sshll.u32 %s2561_s1, 4  ;;  %s2392_s2 = scalar_lea.vmem %s513_s29, 2048  ;;  %s529_s16 = int_to_ptr.vmem [resolvable:$true] %s528_s16 }
  0x80   : > { %p2393_p2 = scmp.ne.s32.totalorder %s513_s29, %s2392_s2  ;;  %p2400_p1 = scmp.lt.s32.totalorder %s513_s29, %s513_s29 }
  0x81   : > { %p2401_p3 = scmp.lt.s32.totalorder %s2392_s2, %s2392_s2 }
  0x82   : > { %p2395_p8 = pnand %p2393_p2, %p2709_p7 }
  0x83   : > { %p2402_p4 = por %p2401_p3, %p2400_p1 }
  0x84   : > { %p2396_p11 = pneg %p2395_p8 }
  0x86   : > { %p2403_p6 = pnand %p2402_p4, %p2396_p11 }
  0x88   : > { %2406 = shalt.err (!%p2403_p6)
}
  0x89   : > { %2094 = dma.hbm_to_vmem [thread:$0]  (!%p3153_p12), %s3091_s12, 2048, %s513_s29, [#allocation12], %s3152_s13, %s3152_s13, %s3151_s10  }
  0x8a   : > { %s2418_s20 = scalar_lea.vmem %s529_s16, 2048  ;;  %p2426_p2 = scmp.lt.s32.totalorder %s529_s16, %s529_s16 }
  0x8b   : > { %p2419_p9 = scmp.ne.s32.totalorder %s529_s16, %s2418_s20  ;;  %p2427_p8 = scmp.lt.s32.totalorder %s2418_s20, %s2418_s20 }
  0x8d   : > { %p2421_p13 = pnand %p2419_p9, %p2709_p7  ;;  %p2428_p11 = por %p2427_p8, %p2426_p2 }
  0x8f   : > { %p2422_p10 = pneg %p2421_p13 }
  0x91   : > { %p2429_p1 = pnand %p2428_p11, %p2422_p10 }
  0x93   : > { %2432 = shalt.err (!%p2429_p1)
}
  0x94   : > { %s3154_s2 = smov 4   ;;  %s3155_s15 = smov 64  }
  0x95   : > { %2097 = dma.hbm_to_vmem [thread:$0]  (!%p3153_p12), %s3093_s14, 2048, %s529_s16, [#allocation15], %s3155_s15, %s3155_s15, %s3154_s2  }
  0x96   : > { %s2433_s25 = scalar_lea.hbm %s2790_s8, 256  ;;  %s2438_s24 = scalar_lea.hbm %s3082_s3, 512 }
  0x97   : > { %p2434_p7 = scmp.ne.s32.totalorder %s2790_s8, %s2433_s25  ;;  %p2439_p6 = scmp.lt.s32.totalorder %s2790_s8, %s3082_s3 }
  0x98   : > { %p2440_p9 = scmp.lt.s32.totalorder %s2438_s24, %s2433_s25 }
  0x99   : > { %p2436_p3 = pnand %p2434_p7, %p2329_p5 }
  0x9a   : > { %p2441_p13 = por %p2440_p9, %p2439_p6 }
  0x9b   : > { %p2437_p4 = pneg %p2436_p3 }
  0x9d   : > { %p2442_p10 = pnand %p2441_p13, %p2437_p4 }
  0x9f   : > { %2445 = shalt.err (!%p2442_p10)
}
  0xa0   : > { %s2446_s16 = scalar_lea.vmem %s2823_s28, 256  ;;  %s2562_s19 = smov [#allocation9]  }
  0xa1   : > { %p2447_p12 = scmp.ne.s32.totalorder %s2823_s28, %s2446_s16  ;;  %s2451_s20 = sshll.u32 %s2562_s19, 4  ;;  %s2452_s20 = int_to_ptr.vmem [resolvable:$false] %s2451_s20 }
  0xa2   : > { %s2453_s2 = scalar_lea.vmem %s2452_s20, 512  ;;  %p2454_p11 = scmp.lt.s32.totalorder %s2823_s28, %s2452_s20 }
  0xa3   : > { %p2449_p2 = pnand %p2447_p12, %p2329_p5  ;;  %p2455_p1 = scmp.lt.s32.totalorder %s2453_s2, %s2446_s16 }
  0xa5   : > { %p2450_p8 = pneg %p2449_p2  ;;  %p2456_p7 = por %p2455_p1, %p2454_p11 }
  0xa7   : > { %p2457_p3 = pnand %p2456_p7, %p2450_p8 }
  0xa9   : > { %2460 = shalt.err (!%p2457_p3)
}
  0xaa   : > { %2104 = dma.hbm_to_vmem [thread:$0]  (!%p2781_p0), %s2790_s8, 256, %s2823_s28, %s2792_s17, %s3152_s13, %s3152_s13, %s3151_s10  }
  0xab   : > { %p3156_p5 = scmp.ne.s32.totalorder %s3136_s22, 0 }
  0xac   : > { %s609_s15 = sand.u32 (!%p3156_p5), 1, %s2689_s21   ;;  %s2882_s30 = sand.u32 (!%p3156_p5), 1, %s2539_s0  }
  0xad   : > { %607 = sbr.rel (%p3156_p5) target bundleno = 2392 (0x958), region = 88  ;;  %s1860_s26 = sshll.u32 (!%p3156_p5), %s2882_s30, 4 }
  0xae   : > { %s610_s25 = scalar_lea.sflag (!%p3156_p5), [#allocation5], %s609_s15  ;;  %s2885_s27 = scalar_lea.vmem (!%p3156_p5), [#allocation4], %s1860_s26 }
  0xaf   : > { %p3157_p4 = scmp.ne.s32.totalorder (!%p3156_p5), %s3144_s23, 0 }
  0xb2   : > { %2506 = dma.done.wait (%p3157_p4), %s610_s25, 256  }
  0xb3   : > { %2508 = vsyncadd (%p3157_p4), %s610_s25, 4294967040  ;;  %p3158_p0 = scmp.eq.s32.totalorder %s2689_s21, 0 }
  0xb5   : > { %2510 = dma.done.wait (%p3158_p0), [#allocation8], 256   ;;  %p3159_p6 = pmov %p3158_p0 }
  0xb6   : > { %s2895_s22 = scalar_lea.vmem [#allocation9], %s1860_s26 }
  0xb7   : > { %2512 = vsyncadd (%p3159_p6), [#allocation8], 4294967040 }
  0xb8   : > { %2514 = dma.done.wait (%p3157_p4), %s610_s25, 256  }
  0xb9   : > { %2516 = vsyncadd (%p3157_p4), %s610_s25, 4294967040  ;;  %p3160_p9 = pmov %p3158_p0 }
  0xba   : > { %p3161_p13 = pmov %p3158_p0 }
  0xbb   : > { %2518 = dma.done.wait (%p3160_p9), [#allocation8], 3072  }
  0xbc   : > { %2520 = vsyncadd (%p3161_p13), [#allocation8], 4294964224  ;;  %p3162_p10 = pmov %p3158_p0 }
  0xbd   : > { %p3163_p12 = pmov %p3158_p0 }
  0xbe   : > { %2522 = dma.done.wait (%p3162_p10), [#allocation12], 3072  }
  0xbf   : > { %2524 = vsyncadd (%p3163_p12), [#allocation12], 4294964224  ;;  %p3164_p2 = pmov %p3158_p0 }
  0xc0   : > { %p3165_p8 = pmov %p3158_p0 }
  0xc1   : > { %2526 = dma.done.wait (%p3164_p2), [#allocation15], 2048  }
  0xc2   : > { %2528 = vsyncadd (%p3165_p8), [#allocation15], 4294965248  ;;  %v2563_v0 = vmov 0   ;;  %v2564_v1 = vmov 0.0   ;;  %v2171_v2 = vld [vmem:[#allocation10 + $0xac] ss:$12 sps:$4 sm:$0xff]   ;;  %v740_v5 = vlaneseq }
  0xc3   : > { %1037 = vmatprep.mubr.bf16.mxu0 %v2563_v0  ;;  %2004 = vmatprep.subr.bf16.mxu1 %v2564_v1  ;;  %v2173_v3 = vld [vmem:[#allocation10 + $0xa8] ss:$12 sps:$4 sm:$0xff]   ;;  %v2176_v6 = vld [vmem:[#allocation10 + $0x90] ss:$12 sps:$4 sm:$0xff]   ;;  %s711_s23 = sld [smem:[#allocation3 + %s2689_s21]]  ;;  %p704_p11 = scmp.lt.s32.totalorder %s2689_s21, 1 }
  0xc4   : > { %1005 = vmatprep.subr.bf16.mxu0 %v2171_v2  ;;  %v2174_v4 = vld [vmem:[#allocation10 + $0x94] ss:$12 sps:$4 sm:$0xff]   ;;  %v2177_v7 = vld [vmem:[#allocation10 + $0x7c] ss:$12 sps:$4 sm:$0xff]   ;;  %v2918_v8 = vshrl.u32 %v740_v5, 7  ;;  %vm2565_vm2 = vmmov 0  }
  0xc5   : > { %1006 = vmatpush1.bf16.msra.mxu0 %v2173_v3  ;;  %v2179_v9 = vld [vmem:[#allocation10 + $0x78] ss:$12 sps:$4 sm:$0xff]   ;;  %s2921_s8 = scalar_select %p704_p11, %s2689_s21, 1  ;;  %v2182_v11 = vld [vmem:[#allocation10 + $0x60] ss:$12 sps:$4 sm:$0xff]   ;;  %v714_v15 = vld [vmem:[#allocation7] sm:$0xff]  ;;  %2020 = vmatprep.mubr.msk.bf16.mxu1 %vm2565_vm2, %v2564_v1 }
  0xc6   : > { %1007 = vmatprep.subr.bf16.mxu0 %v2174_v4  ;;  %v2180_v10 = vld [vmem:[#allocation10 + $0x64] ss:$12 sps:$4 sm:$0xff]   ;;  %v742_v13 = vadd.s32 8, %v2918_v8  ;;  %v713_v14 = vld [vmem:[%s2885_s27 + $0x8] sm:$0xff]  ;;  %v719_v22 = vld [vmem:[%s2895_s22 + $0x8] sm:$0xff]  ;;  %v868_v51 = vsub.s32 1, %v2918_v8 }
  0xc7   : > { %v712_v12 = vld [vmem:[%s2885_s27] sm:$0xff]  ;;  %v715_v16 = vld [vmem:[#allocation7 + $0x8] sm:$0xff]  ;;  %s706_s13 = scalar_lea.vmem %s3083_s4, %s2921_s8  ;;  %v718_v21 = vld [vmem:[%s2895_s22] sm:$0xff]  ;;  %s709_s29 = scalar_lea.vmem %s3084_s5, %s2921_s8  ;;  %v864_v57 = vsub.s32 0, %v2918_v8  ;;  %v872_v4 = vsub.s32 2, %v2918_v8  ;;  %vm1133_vm4 = vcmask 130048  }
  0xc8   : > { %v2183_v18 = vld [vmem:[#allocation10 + $0x4c] ss:$12 sps:$4 sm:$0xff]   ;;  %v716_v19 = vadd.f32 %v714_v15, %v712_v12  ;;  %v717_v20 = vadd.f32 %v715_v16, %v713_v14  ;;  %v2185_v23 = vld [vmem:[#allocation10 + $0x48] ss:$12 sps:$4 sm:$0xff]   ;;  %v2195_v27 = vld [vmem:[#allocation10 + $0xb0] ss:$12 sps:$4 sm:$0xff]  }
  0xc9   : > { %1008 = vmatpush1.bf16.msra.mxu0 %v2176_v6  ;;  %v2926_v17 = vstv %s711_s23  ;;  %v2186_v24 = vld [vmem:[#allocation10 + $0x34] ss:$12 sps:$4 sm:$0xff]   ;;  %v1868_v28 = vld [vmem:[%s706_s13] ss:$0 sm:$0xff]  ;;  %2005 = vmatpush3.bf16.msra.mxu1 %v2195_v27  ;;  %v2196_v29 = vld [vmem:[#allocation10 + $0x98] ss:$12 sps:$4 sm:$0xff]  }
  0xca   : > { %1009 = vmatprep.subr.bf16.mxu0 %v2177_v7  ;;  %v720_v25 = vadd.f32 %v718_v21, %v716_v19  ;;  %v721_v26 = vadd.f32 %v719_v22, %v717_v20  ;;  %vm744_vm0 = vcmp.lt.s32.totalorder %v2918_v8, %v2926_v17  ;;  %vm745_vm1 = vcmp.lt.s32.totalorder %v742_v13, %v2926_v17  ;;  %v2188_v32 = vld [vmem:[#allocation10 + $0x30] ss:$12 sps:$4 sm:$0xff]   ;;  %v2197_v37 = vld [vmem:[#allocation10 + $0x80] ss:$12 sps:$4 sm:$0xff]   ;;  %v2191_v38 = vld [vmem:[#allocation10 + $0x18] ss:$12 sps:$4 sm:$0xff]  }
  0xcb   : > { %v1870_v30 = vsel %vm744_vm0, 1.0, %v2564_v1  ;;  %v1871_v31 = vsel %vm745_vm1, 1.0, %v2564_v1  ;;  %2006 = vmatprep.subr.bf16.mxu1 %v2564_v1  ;;  %v1869_v35 = vld [vmem:[%s709_s29] ss:$0 sm:$0xff]  ;;  %v2189_v36 = vld [vmem:[#allocation10 + $0x1c] ss:$12 sps:$4 sm:$0xff]  }
  0xcc   : > { %v729_v33 = vadd.f32 %v1868_v28, %v720_v25  ;;  %v730_v34 = vadd.f32 %v1868_v28, %v721_v26  ;;  %v2192_v39 = vld [vmem:[#allocation10 + $0x4] ss:$12 sps:$4 sm:$0xff]   ;;  %v2198_v42 = vld [vmem:[#allocation10 + $0x68] ss:$12 sps:$4 sm:$0xff]   ;;  %v2194_v43 = vld [vmem:[#allocation10] ss:$12 sps:$4 sm:$0xff]  }
  0xcd   : > { %1010 = vmatpush1.bf16.msra.mxu0 %v2179_v9  ;;  %2007 = vmatpush3.bf16.msra.mxu1 %v2196_v29  ;;  %v2199_v46 = vld [vmem:[#allocation10 + $0x50] ss:$12 sps:$4 sm:$0xff]   ;;  %v2200_v48 = vld [vmem:[#allocation10 + $0x38] ss:$12 sps:$4 sm:$0xff]   ;;  %v2201_v49 = vld [vmem:[#allocation10 + $0x20] ss:$12 sps:$4 sm:$0xff]  }
  0xce   : > { %1011 = vmatprep.subr.bf16.mxu0 %v2180_v10  ;;  %2008 = vmatprep.subr.bf16.mxu1 %v2564_v1  ;;  %v738_v40 = vadd.f32 %v1869_v35, %v729_v33  ;;  %v739_v41 = vadd.f32 %v1869_v35, %v730_v34  ;;  %v2202_v50 = vld [vmem:[#allocation10 + $0x8] ss:$12 sps:$4 sm:$0xff]   ;;  %v788_v53 = vld [vmem:[%s3086_s7] sm:$0x7]  ;;  %v753_v15 = vand.u32 127, %v740_v5  ;;  %v2203_v35 = vld [vmem:[#allocation11 + $0x38] sm:$0xff]  }
  0xcf   : > { %v869_v55 = vrot.slane %v788_v53, %v868_v51  ;;  %v865_v62 = vrot.slane %v788_v53, %v864_v57  ;;  %v873_v6 = vrot.slane %v788_v53, %v872_v4  ;;  %v2566_v16 = vmov -1e+09   ;;  %v2211_v4 = vld [vmem:[#allocation13 + $0x70] ss:$8 sps:$4 sm:$0xff]   ;;  %s3166_s2 = sld [smem:[#allocation36_spill]]  ;;  %s1867_s13 = sshll.u32 %s2882_s30, 3 }
  0xd0   : > { %v2946_v44 = vmul.f32 %v1870_v30, %v738_v40  ;;  %v2948_v45 = vmul.f32 %v1871_v31, %v739_v41  ;;  %vm754_vm3 = vcmp.lt.s32.totalorder %v753_v15, %v2926_v17  ;;  %v2208_v40 = vld [vmem:[#allocation11 + $0x10] sm:$0xff]   ;;  %v2214_v15 = vld [vmem:[#allocation13 + $0x60] ss:$8 sps:$4 sm:$0xff]   ;;  %s3167_s25 = sld [smem:[#allocation37_spill]]  ;;  %s1954_s19 = sshll.u32 %s2689_s21, 7 }
  0xd1   : > { %1012 = vmatpush1.bf16.msra.mxu0 %v2182_v11  ;;  %2009 = vmatpush3.bf16.msra.mxu1 %v2197_v37  ;;  %v2205_v37 = vld [vmem:[#allocation11 + $0x28] sm:$0xff]   ;;  %s3168_s23 = sld [smem:[#allocation38_spill]]  ;;  %s703_s20 = scalar_lea.vmem [#allocation16], %s1867_s13 }
  0xd2   : > { %1013 = vmatprep.subr.bf16.mxu0 %v2183_v18  ;;  %2010 = vmatprep.subr.bf16.mxu1 %v2564_v1  ;;  %v860_v47 = vpack.c.bf16 %v2948_v45, %v2946_v44  ;;  %v755_v18 = vsel %vm754_vm3, 0.0, %v2566_v16  ;;  %v2219_v16 = vld [vmem:[#allocation13 + $0x54] ss:$8 sps:$4 sm:$0xff]   ;;  %s3169_s10 = sld [smem:[#allocation39_spill]]  ;;  %s1673_s22 = scalar_lea.sflag [#allocation6], %s2882_s30 }
  0xd3   : > { %s3170_s29 = sld [smem:[#allocation40_spill]]  ;;  %s2567_s21 = smov [#allocation16]  }
  0xd4   : > { %s3171_s24 = sld [smem:[#allocation30_spill]]  ;;  %s2465_s8 = sshll.u32 %s2567_s21, 4  ;;  %s2466_s8 = int_to_ptr.vmem [resolvable:$false] %s2465_s8 }
  0xd5   : > { %1014 = vmatpush1.bf16.msra.mxu0 %v2185_v23  ;;  %2011 = vmatpush3.bf16.msra.mxu1 %v2198_v42  ;;  %s3172_s16 = sld [smem:[#allocation41_spill]]  ;;  %s2467_s17 = scalar_lea.vmem %s2466_s8, 256 }
  0xd6   : > { %1015 = vmatprep.subr.bf16.mxu0 %v2186_v24  ;;  %2012 = vmatprep.subr.bf16.mxu1 %v2564_v1 }
  0xd8   : > { %v1924_v8 = vld [vmem:[%s3169_s10] ss:$0 sm:$0xff] }
  0xd9   : > { %1016 = vmatpush1.bf16.msra.mxu0 %v2188_v32  ;;  %2013 = vmatpush3.bf16.msra.mxu1 %v2199_v46 }
  0xda   : > { %1017 = vmatprep.subr.bf16.mxu0 %v2189_v36  ;;  %2014 = vmatprep.subr.bf16.mxu1 %v2564_v1  ;;  %v2204_v36 = vld [vmem:[#allocation11 + $0x30] sm:$0xff]   ;;  %p3174_p7 = scmp.ne.s32.totalorder %s3171_s24, 0 }
  0xdd   : > { %1018 = vmatpush1.bf16.msra.mxu0 %v2191_v38  ;;  %2015 = vmatpush3.bf16.msra.mxu1 %v2200_v48  ;;  %v2206_v38 = vld [vmem:[#allocation11 + $0x20] sm:$0xff]  }
  0xde   : > { %1019 = vmatprep.subr.bf16.mxu0 %v2192_v39  ;;  %2016 = vmatprep.subr.bf16.mxu1 %v2564_v1  ;;  %v2207_v39 = vld [vmem:[#allocation11 + $0x18] sm:$0xff]  }
  0xe1   : > { %1020 = vmatpush1.bf16.msra.mxu0 %v2194_v43  ;;  %2017 = vmatpush3.bf16.msra.mxu1 %v2201_v49 }
  0xe2   : > { %2036 = vmatprep.subr.bf16.mxu0 %v2564_v1  ;;  %2018 = vmatprep.subr.bf16.mxu1 %v2564_v1 }
  0xe4   : > { %1038 = vmatmul.mubr.bf16.vlgmr.msra.gmra.mxu0 %v860_v47 }
  0xe5   : > { %2019 = vmatpush3.bf16.msra.mxu1 %v2202_v50  ;;  %2052 = vmatprep.mubr.msk.bf16.mxu0 %vm2565_vm2, %v2564_v1  ;;  %v2209_v50 = vld [vmem:[#allocation11 + $0x8] sm:$0xff]  }
  0xe6   : > { %2024 = vmatprep.subr.bf16.mxu1 %v2564_v1  ;;  %2037 = vmatpush3.bf16.msra.mxu0 %v2203_v35  ;;  %v2243_v35 = vld [vmem:[#allocation14 + $0x58] sm:$0xff]  }
  0xe7   : > { %2038 = vmatprep.subr.bf16.mxu0 %v2564_v1 }
  0xe8   : > { %2021 = vmatmul.mubr.bf16.vlgmr.msra.gmra.mxu1 %v860_v47 }
  0xe9   : > { %2026 = vmatprep.mubr.msk.bf16.mxu1 %vm2565_vm2, %v2564_v1 }
  0xea   : > { %2039 = vmatpush3.bf16.msra.mxu0 %v2204_v36  ;;  %v2244_v36 = vld [vmem:[#allocation14 + $0x18] sm:$0xff]  }
  0xeb   : > { %2040 = vmatprep.subr.bf16.mxu0 %v2564_v1 }
  0xee   : > { %2041 = vmatpush3.bf16.msra.mxu0 %v2205_v37 }
  0xef   : > { %2042 = vmatprep.subr.bf16.mxu0 %v2564_v1 }
  0xf2   : > { %2043 = vmatpush3.bf16.msra.mxu0 %v2206_v38 }
  0xf3   : > { %2044 = vmatprep.subr.bf16.mxu0 %v2564_v1 }
  0xf6   : > { %2045 = vmatpush3.bf16.msra.mxu0 %v2207_v39 }
  0xf7   : > { %2046 = vmatprep.subr.bf16.mxu0 %v2564_v1 }
  0xfa   : > { %2047 = vmatpush3.bf16.msra.mxu0 %v2208_v40 }
  0xfb   : > { %2048 = vmatprep.subr.bf16.mxu0 %v2564_v1 }
  0xfe   : > { %2049 = vmatpush3.bf16.msra.mxu0 %v2209_v50 }
  0xff   : > { %2050 = vmatprep.subr.bf16.mxu0 %v2564_v1 }
 0x1a4   : > { %v1039_v52 = vpop.f32.mrf.mxu0 }
 0x1a5   : > { %v1040_v2 = vadd.f32 %v1039_v52, %v865_v62  ;;  %v2210_v52 = vld [vmem:[#allocation11] sm:$0xff]  }
 0x1a6   : > { %v1041_v54 = vpop.f32.mrf.mxu0  ;;  %2051 = vmatpush3.bf16.msra.mxu0 %v2210_v52  ;;  %v1907_v52 = vld [vmem:[%s3167_s25] ss:$0 sm:$0xff]  ;;  %s3173_s25 = sld [smem:[#allocation42_spill]] }
 0x1a7   : > { %v1042_v59 = vadd.f32 %v1041_v54, %v869_v55 }
 0x1a8   : > { %v1043_v56 = vpop.f32.mrf.mxu0  ;;  %v1082_v7 = vpop.f32.mrf.mxu1 }
 0x1a9   : > { %v1044_v63 = vadd.f32 %v1043_v56, %v865_v62  ;;  %v1083_v10 = vadd.f32 %v1082_v7, %v873_v6 }
 0x1aa   : > { %v1045_v58 = vpop.f32.mrf.mxu0  ;;  %v2022_v9 = vpop.f32.mrf.mxu1 }
 0x1ab   : > { %v1046_v60 = vadd.f32 %v1045_v58, %v869_v55  ;;  %v1089_v3 = vpack.c.bf16 %v1044_v63, %v1040_v2 }
 0x1ac   : > { %v1085_v11 = vpop.f32.mrf.mxu1  ;;  %s3034_s27 = scalar_lea.hbm %s3173_s25, %s1954_s19 }
 0x1ad   : > { %v1090_v61 = vpack.c.bf16 %v1046_v60, %v1042_v59  ;;  %v1086_v12 = vadd.f32 %v1085_v11, %v873_v6  ;;  %v1897_v59 = vld [vmem:[%s3088_s9] ss:$0 sm:$0xff]  ;;  %v2213_v6 = vld [vmem:[#allocation13 + $0x74] ss:$8 sps:$4 sm:$0xff]  }
 0x1ae   : > { %v2023_v13 = vpop.f32.mrf.mxu1 }
 0x1af   : > { %2025 = vmatpush3.bf16.xpose.msra.mxu1 %v1090_v61  ;;  %v1091_v14 = vpack.c.bf16 %v1086_v12, %v1083_v10 }
 0x1b0   : > { %2030 = vmatprep.subr.bf16.mxu1 %v2564_v1 }
 0x1b6   : > { %2027 = vmatmul.mubr.bf16.vlgmr.msra.gmra.mxu1 %v1089_v3 }
 0x1b7   : > { %2032 = vmatprep.mubr.msk.bf16.mxu1 %vm2565_vm2, %v2564_v1  ;;  %2031 = vmatpush3.bf16.msra.mxu1 %v1091_v14  ;;  %v2216_v14 = vld [vmem:[#allocation13 + $0x64] ss:$8 sps:$4 sm:$0xff]  }
 0x1b8   : > { %1430 = vmatprep.subr.bf16.mxu1 %v2213_v6 }
 0x276   : > { %v1126_v19 = vpop.f32.mrf.mxu1 }
 0x277   : > { %v1127_v20 = vadd.f32 %v1126_v19, %v755_v18  ;;  %v2220_v19 = vld [vmem:[#allocation13 + $0x40] ss:$8 sps:$4 sm:$0xff]  }
 0x278   : > { %v2028_v21 = vpop.f32.mrf.mxu1 }
 0x279   : > { %v1134_v22 = vsel %vm1133_vm4, %v1127_v20, -inf  ;;  %v2225_v21 = vld [vmem:[#allocation13 + $0x34] ss:$8 sps:$4 sm:$0xff]  }
 0x27a   : > { %1135 = vmax.xlane.f32.xlu0 %v1134_v22  ;;  %v1129_v23 = vpop.f32.mrf.mxu1  ;;  %v2223_v22 = vld [vmem:[#allocation13 + $0x30] ss:$8 sps:$4 sm:$0xff]  }
 0x27b   : > { %v1130_v24 = vadd.f32 %v1129_v23, %v755_v18  ;;  %v2217_v18 = vld [vmem:[#allocation13 + $0x50] ss:$8 sps:$4 sm:$0xff]   ;;  %v2228_v23 = vld [vmem:[#allocation13 + $0x24] ss:$8 sps:$4 sm:$0xff]  }
 0x27c   : > { %v2029_v25 = vpop.f32.mrf.mxu1 }
 0x27d   : > { %v1137_v26 = vsel %vm1133_vm4, %v1130_v24, -inf  ;;  %v2231_v25 = vld [vmem:[#allocation13 + $0x14] ss:$8 sps:$4 sm:$0xff]  }
 0x27e   : > { %1138 = vmax.xlane.f32.xlu0 %v1137_v26  ;;  %v2229_v26 = vld [vmem:[#allocation13 + $0x10] ss:$8 sps:$4 sm:$0xff]  }
 0x303   : > { %v1136_v27 = vpop.xlane.xlu0 %1135 }
 0x304   : > { %v1140_v28 = vsub.f32 %v1127_v20, %v1136_v27  ;;  %v2222_v20 = vld [vmem:[#allocation13 + $0x44] ss:$8 sps:$4 sm:$0xff]  }
 0x305   : > { %v2234_v27 = vld [vmem:[#allocation13 + $0x4] ss:$8 sps:$4 sm:$0xff]  }
 0x306   : > { %v1142_v5 = vmul.f32 1.442695, %v1140_v28  ;;  %v2232_v28 = vld [vmem:[#allocation13] ss:$8 sps:$4 sm:$0xff]  }
 0x307   : > { %v1139_v29 = vpop.xlane.xlu0 %1138 }
 0x308   : > { %2251 = vpow2.f32 %v1142_v5  ;;  %v1141_v17 = vsub.f32 %v1130_v24, %v1139_v29  ;;  %v2226_v24 = vld [vmem:[#allocation13 + $0x20] ss:$8 sps:$4 sm:$0xff]   ;;  %v2235_v5 = vld [vmem:[#allocation14 + $0x78] sm:$0xff]  }
 0x309   : > { %v2236_v29 = vld [vmem:[#allocation14 + $0x38] sm:$0xff]   ;;  %1982 = vmatprep.subr.bf16.mxu0 %v2235_v5 }
 0x30a   : > { %v1144_v30 = vmul.f32 1.442695, %v1141_v17  ;;  %v2237_v17 = vld [vmem:[#allocation14 + $0x70] sm:$0xff]  }
 0x30c   : > { %2253 = vpow2.f32 %v1144_v30  ;;  %v2238_v30 = vld [vmem:[#allocation14 + $0x30] sm:$0xff]  }
 0x315   : > { %v2252_v31 = vpop.eup %2251 }
 0x316   : > { %v1146_v32 = vsel %vm1133_vm4, %v2252_v31, 0.0 }
 0x317   : > { %1147 = vadd.xlane.f32.xlu1 %v1146_v32  ;;  %v2240_v32 = vld [vmem:[#allocation14 + $0x28] sm:$0xff]  }
 0x319   : > { %v2254_v33 = vpop.eup %2253 }
 0x31a   : > { %v1149_v34 = vsel %vm1133_vm4, %v2254_v33, 0.0 }
 0x31b   : > { %1150 = vadd.xlane.f32.xlu1 %v1149_v34  ;;  %v2242_v34 = vld [vmem:[#allocation14 + $0x20] sm:$0xff]  }
 0x3a0   : > { %v1148_v41 = vpop.xlane.xlu1 %1147 }
 0x3a1   : > { %2255 = vrcp.f32 %v1148_v41 }
 0x3a4   : > { %v1151_v42 = vpop.xlane.xlu1 %1150 }
 0x3a5   : > { %2257 = vrcp.f32 %v1151_v42 }
 0x3ae   : > { %v2256_v43 = vpop.eup %2255 }
 0x3af   : > { %v1154_v47 = vmul.f32 %v2256_v43, %v2252_v31  ;;  %v2239_v31 = vld [vmem:[#allocation14 + $0x68] sm:$0xff]  }
 0x3b2   : > { %v2258_v46 = vpop.eup %2257 }
 0x3b3   : > { %v1155_v48 = vmul.f32 %v2258_v46, %v2254_v33  ;;  %v2241_v33 = vld [vmem:[#allocation14 + $0x60] sm:$0xff]  }
 0x3b5   : > { %v1156_v49 = vpack.c.bf16 %v1155_v48, %v1154_v47  ;;  %v1906_v47 = vld [vmem:[%s3166_s2] ss:$0 sm:$0xff]  ;;  %s1686_s2 = sshll.u32 %s703_s20, 4  ;;  %s3036_s2 = int_to_ptr.vmem [resolvable:$true] %s1686_s2 }
 0x3b6   : > { %p2468_p4 = scmp.lt.s32.totalorder %s3036_s2, %s2466_s8 }
 0x3b7   : > { %2033 = vmatmul.mubr.msk.bf16.vlgmr.msra.gmra.mxu1 %vm1133_vm4, %v1156_v49 }
 0x3b8   : > { %1462 = vmatprep.mubr.bf16.mxu1 %v2563_v0  ;;  %1431 = vmatpush1.bf16.msra.mxu1 %v2211_v4 }
 0x3b9   : > { %1432 = vmatprep.subr.bf16.mxu1 %v2216_v14 }
 0x3bc   : > { %1433 = vmatpush1.bf16.msra.mxu1 %v2214_v15 }
 0x3bd   : > { %1434 = vmatprep.subr.bf16.mxu1 %v2219_v16 }
 0x3c0   : > { %1435 = vmatpush1.bf16.msra.mxu1 %v2217_v18 }
 0x3c1   : > { %1436 = vmatprep.subr.bf16.mxu1 %v2222_v20 }
 0x3c4   : > { %1437 = vmatpush1.bf16.msra.mxu1 %v2220_v19 }
 0x3c5   : > { %1438 = vmatprep.subr.bf16.mxu1 %v2225_v21 }
 0x3c8   : > { %1439 = vmatpush1.bf16.msra.mxu1 %v2223_v22 }
 0x3c9   : > { %1440 = vmatprep.subr.bf16.mxu1 %v2228_v23 }
 0x3cc   : > { %1441 = vmatpush1.bf16.msra.mxu1 %v2226_v24 }
 0x3cd   : > { %1442 = vmatprep.subr.bf16.mxu1 %v2231_v25 }
 0x3d0   : > { %1443 = vmatpush1.bf16.msra.mxu1 %v2229_v26 }
 0x3d1   : > { %1444 = vmatprep.subr.bf16.mxu1 %v2234_v27 }
 0x3d4   : > { %1445 = vmatpush1.bf16.msra.mxu1 %v2232_v28 }
 0x477   : > { %v1194_v53 = vpop.f32.mrf.mxu1 }
 0x479   : > { %v2034_v54 = vpop.f32.mrf.mxu1 }
 0x47b   : > { %v1197_v55 = vpop.f32.mrf.mxu1 }
 0x47c   : > { %v1201_v56 = vpack.c.bf16 %v1197_v55, %v1194_v53 }
 0x47d   : > { %v2035_v58 = vpop.f32.mrf.mxu1 }
 0x47e   : > { %2053 = vmatmul.mubr.bf16.vlgmr.msra.gmra.mxu0 %v1201_v56  ;;  %v2245_v58 = vld [vmem:[#allocation14 + $0x50] sm:$0xff]  }
 0x47f   : > { %1983 = vmatpush3.bf16.msra.mxu0 %v2236_v29 }
 0x480   : > { %1984 = vmatprep.subr.bf16.mxu0 %v2237_v17 }
 0x483   : > { %1985 = vmatpush3.bf16.msra.mxu0 %v2238_v30 }
 0x484   : > { %1986 = vmatprep.subr.bf16.mxu0 %v2239_v31 }
 0x487   : > { %1987 = vmatpush3.bf16.msra.mxu0 %v2240_v32 }
 0x488   : > { %1988 = vmatprep.subr.bf16.mxu0 %v2241_v33 }
 0x48b   : > { %1989 = vmatpush3.bf16.msra.mxu0 %v2242_v34 }
 0x48c   : > { %1990 = vmatprep.subr.bf16.mxu0 %v2243_v35 }
 0x48f   : > { %1991 = vmatpush3.bf16.msra.mxu0 %v2244_v36 }
 0x490   : > { %1992 = vmatprep.subr.bf16.mxu0 %v2245_v58 }
 0x53e   : > { %v1290_v60 = vpop.f32.mrf.mxu0 }
 0x53f   : > { %v1291_v61 = vadd.f32 %v1897_v59, %v1290_v60  ;;  %v2247_v60 = vld [vmem:[#allocation14 + $0x48] sm:$0xff]  }
 0x540   : > { %v2054_v62 = vpop.f32.mrf.mxu0 }
 0x541   : > { %v1297_v0 = vadd.f32 %v1291_v61, %v2946_v44  ;;  %v2248_v61 = vld [vmem:[#allocation14 + $0x8] sm:$0xff]   ;;  %v2249_v62 = vld [vmem:[#allocation14 + $0x40] sm:$0xff]  }
 0x542   : > { %v1293_v63 = vpop.f32.mrf.mxu0 }
 0x543   : > { %v1294_v2 = vadd.f32 %v1897_v59, %v1293_v63  ;;  %1299 = vadd.xlane.f32.xlu0 %v1297_v0  ;;  %v2246_v59 = vld [vmem:[#allocation14 + $0x10] sm:$0xff]  }
 0x544   : > { %v2055_v1 = vpop.f32.mrf.mxu0  ;;  %1993 = vmatpush3.bf16.msra.mxu0 %v2246_v59  ;;  %v824_v63 = vld [vmem:[%s3168_s23] sm:$0x3]  ;;  %s2461_s23 = scalar_lea.vmem %s3036_s2, 128 }
 0x545   : > { %v1298_v3 = vadd.f32 %v1294_v2, %v2948_v45  ;;  %1994 = vmatprep.subr.bf16.mxu0 %v2247_v60  ;;  %v1347_v1 = vrot.slane %v824_v63, %v868_v51  ;;  %p2462_p1 = scmp.ne.s32.totalorder %s3036_s2, %s2461_s23  ;;  %p2469_p0 = scmp.lt.s32.totalorder %s2467_s17, %s2461_s23 }
 0x547   : > { %1301 = vadd.xlane.f32.xlu1 %v1298_v3  ;;  %p2463_p3 = pnand %p2462_p1, %p3174_p7  ;;  %p2470_p6 = por %p2469_p0, %p2468_p4 }
 0x548   : > { %1995 = vmatpush3.bf16.msra.mxu0 %v2248_v61 }
 0x549   : > { %1996 = vmatprep.subr.bf16.mxu0 %v2249_v62  ;;  %p2464_p5 = pneg %p2463_p3 }
 0x54b   : > { %p2471_p9 = pnand %p2470_p6, %p2464_p5 }
 0x5cc   : > { %v1300_v7 = vpop.xlane.xlu0 %1299 }
 0x5cd   : > { %v1304_v9 = vmul.f32 0.0078125, %v1300_v7 }
 0x5cf   : > { %v2997_v10 = vsub.f32 %v1297_v0, %v1304_v9  ;;  %v2250_v0 = vld [vmem:[#allocation14] sm:$0xff]  }
 0x5d0   : > { %v1302_v11 = vpop.xlane.xlu1 %1301  ;;  %1997 = vmatpush3.bf16.msra.mxu0 %v2250_v0 }
 0x5d1   : > { %v1305_v12 = vmul.f32 0.0078125, %v1302_v11  ;;  %v1308_v44 = vmul.f32 %v2997_v10, %v2997_v10 }
 0x5d3   : > { %v3001_v13 = vsub.f32 %v1298_v3, %v1305_v12  ;;  %1310 = vadd.xlane.f32.xlu0 %v1308_v44  ;;  %v1343_v3 = vrot.slane %v824_v63, %v864_v57 }
 0x5d5   : > { %v1309_v45 = vmul.f32 %v3001_v13, %v3001_v13 }
 0x5d7   : > { %1312 = vadd.xlane.f32.xlu1 %v1309_v45 }
 0x65c   : > { %v1311_v37 = vpop.xlane.xlu0 %1310 }
 0x65d   : > { %v1314_v38 = vmul.f32 0.0078125, %v1311_v37 }
 0x65f   : > { %v1316_v39 = vadd.f32 1e-05, %v1314_v38 }
 0x660   : > { %v1313_v40 = vpop.xlane.xlu1 %1312 }
 0x661   : > { %2259 = vrsqrt.f32 %v1316_v39  ;;  %v1315_v41 = vmul.f32 0.0078125, %v1313_v40  ;;  %v1941_v40 = vld [vmem:[%s3170_s29] ss:$0 sm:$0xff] }
 0x663   : > { %v1317_v42 = vadd.f32 1e-05, %v1315_v41 }
 0x665   : > { %2261 = vrsqrt.f32 %v1317_v42 }
 0x66e   : > { %v2260_v43 = vpop.eup %2259 }
 0x66f   : > { %v1320_v46 = vmul.f32 %v2260_v43, %v2997_v10 }
 0x671   : > { %v1328_v50 = vmul.f32 %v1906_v47, %v1320_v46  ;;  %v1942_v46 = vld [vmem:[%s3172_s16] ss:$0 sm:$0xff] }
 0x672   : > { %v2262_v48 = vpop.eup %2261 }
 0x673   : > { %v1321_v49 = vmul.f32 %v2262_v48, %v3001_v13  ;;  %v1336_v54 = vadd.f32 %v1907_v52, %v1328_v50 }
 0x675   : > { %v1329_v53 = vmul.f32 %v1906_v47, %v1321_v49 }
 0x677   : > { %v1337_v55 = vadd.f32 %v1907_v52, %v1329_v53 }
 0x679   : > { %v1338_v56 = vpack.c.bf16 %v1337_v55, %v1336_v54 }
 0x67b   : > { %1463 = vmatmul.mubr.bf16.vlgmr.msra.gmra.mxu1 %v1338_v56 }
 0x73b   : > { %v1464_v2 = vpop.f32.mrf.mxu1 }
 0x73c   : > { %v1465_v10 = vadd.f32 %v1464_v2, %v1343_v3 }
 0x73d   : > { %v1466_v4 = vpop.f32.mrf.mxu1 }
 0x73e   : > { %v1467_v7 = vadd.f32 %v1466_v4, %v1347_v1  ;;  %v1473_v14 = vmax.f32 %v1465_v10, 0.0 }
 0x73f   : > { %v1468_v6 = vpop.f32.mrf.mxu1 }
 0x740   : > { %v1469_v9 = vadd.f32 %v1468_v6, %v1343_v3  ;;  %v1474_v13 = vmax.f32 %v1467_v7, 0.0 }
 0x741   : > { %v1470_v11 = vpop.f32.mrf.mxu1 }
 0x742   : > { %v1471_v12 = vadd.f32 %v1470_v11, %v1347_v1  ;;  %v1475_v44 = vmax.f32 %v1469_v9, 0.0 }
 0x744   : > { %v1476_v45 = vmax.f32 %v1471_v12, 0.0  ;;  %v1477_v16 = vpack.c.bf16 %v1475_v44, %v1473_v14 }
 0x746   : > { %v1478_v15 = vpack.c.bf16 %v1476_v45, %v1474_v13 }
 0x748   : > { %1613 = vmatprep.mubr.bf16.mxu0 %v1478_v15 }
 0x749   : > { %1614 = vmatmul.mubr.bf16.vlgmr.msra.gmra.mxu0 %v1477_v16 }
 0x809   : > { %v1998_v18 = vpop.f32.mrf.mxu0 }
 0x80b   : > { %v1999_v51 = vpop.f32.mrf.mxu0 }
 0x80c   : > { %v2000_v57 = vadd.f32 %v1999_v51, %v1998_v18 }
 0x80d   : > { %v2001_v19 = vpop.f32.mrf.mxu0 }
 0x80e   : > { %v1616_v20 = vadd.f32 %v2000_v57, %v1924_v8 }
 0x80f   : > { %v2002_v21 = vpop.f32.mrf.mxu0 }
 0x810   : > { %v2003_v22 = vadd.f32 %v2002_v21, %v2001_v19  ;;  %v1622_v23 = vadd.f32 %v1616_v20, %v1336_v54 }
 0x812   : > { %v1619_v24 = vadd.f32 %v2003_v22, %v1924_v8  ;;  %1624 = vadd.xlane.f32.xlu0 %v1622_v23 }
 0x814   : > { %v1623_v25 = vadd.f32 %v1619_v24, %v1337_v55 }
 0x816   : > { %1626 = vadd.xlane.f32.xlu1 %v1623_v25 }
 0x89b   : > { %v1625_v26 = vpop.xlane.xlu0 %1624 }
 0x89c   : > { %v1628_v27 = vmul.f32 0.0078125, %v1625_v26 }
 0x89e   : > { %v1630_v28 = vsub.f32 %v1622_v23, %v1628_v27 }
 0x89f   : > { %v1627_v5 = vpop.xlane.xlu1 %1626 }
 0x8a0   : > { %v1629_v29 = vmul.f32 0.0078125, %v1627_v5  ;;  %v1632_v17 = vmul.f32 %v1630_v28, %v1630_v28 }
 0x8a2   : > { %v1631_v30 = vsub.f32 %v1623_v25, %v1629_v29  ;;  %1634 = vadd.xlane.f32.xlu0 %v1632_v17 }
 0x8a4   : > { %v1633_v31 = vmul.f32 %v1631_v30, %v1631_v30 }
 0x8a6   : > { %1636 = vadd.xlane.f32.xlu1 %v1633_v31 }
 0x92b   : > { %v1635_v32 = vpop.xlane.xlu0 %1634 }
 0x92c   : > { %v1638_v33 = vmul.f32 0.0078125, %v1635_v32 }
 0x92e   : > { %v1640_v34 = vadd.f32 1e-05, %v1638_v33 }
 0x92f   : > { %v1637_v35 = vpop.xlane.xlu1 %1636 }
 0x930   : > { %2263 = vrsqrt.f32 %v1640_v34  ;;  %v1639_v36 = vmul.f32 0.0078125, %v1637_v35 }
 0x932   : > { %v1641_v37 = vadd.f32 1e-05, %v1639_v36 }
 0x934   : > { %2265 = vrsqrt.f32 %v1641_v37 }
 0x93d   : > { %v2264_v38 = vpop.eup %2263 }
 0x93e   : > { %v1644_v39 = vmul.f32 %v2264_v38, %v1630_v28 }
 0x940   : > { %v1652_v42 = vmul.f32 %v1941_v40, %v1644_v39 }
 0x941   : > { %v2266_v41 = vpop.eup %2265 }
 0x942   : > { %v1645_v43 = vmul.f32 %v2266_v41, %v1631_v30  ;;  %v1660_v48 = vadd.f32 %v1942_v46, %v1652_v42 }
 0x944   : > { %v1653_v47 = vmul.f32 %v1941_v40, %v1645_v43 }
 0x946   : > { %v1661_v49 = vadd.f32 %v1942_v46, %v1653_v47 }
 0x948   : > { %v1958_v50 = vpack.c.bf16 %v1661_v49, %v1660_v48 }
 0x94a   : > { %1959 = vst [vmem:[%s703_s20] sm:$0xff] %v1958_v50  }
 0x94b   : > { %2474 = shalt.err (!%p2471_p9)
}
 0x94c   : > { %s2475_s10 = scalar_lea.hbm %s3034_s27, 128  ;;  %s2479_s18 = scalar_lea.hbm %s3173_s25, 256 }
 0x94d   : > { %p2476_p13 = scmp.ne.s32.totalorder %s3034_s27, %s2475_s10  ;;  %p2480_p2 = scmp.lt.s32.totalorder %s3034_s27, %s3173_s25 }
 0x94e   : > { %p2481_p8 = scmp.lt.s32.totalorder %s2479_s18, %s2475_s10 }
 0x94f   : > { %p2477_p10 = pnand %p2476_p13, %p3174_p7 }
 0x950   : > { %p2482_p11 = por %p2481_p8, %p2480_p2 }
 0x951   : > { %p2478_p12 = pneg %p2477_p10 }
 0x953   : > { %p2483_p1 = pnand %p2482_p11, %p2478_p12 }
 0x955   : > { %2486 = shalt.err (!%p2483_p1)
}
 0x956   : > { %s2568_s11 = smov 64   ;;  %s2569_s16 = smov 4  }
 0x957   : > { %2080 = dma.vmem_to_hbm [thread:$0]  (%p3174_p7), %s3036_s2, 128, %s3034_s27, %s1673_s22, %s2568_s11, %s2568_s11, %s2569_s16  }
 0x958 PF: > { %s3175_s19 = sld [smem:[#allocation25_spill]] }
 0x959   : > { %s3176_s20 = sld [smem:[#allocation31_spill]] }
 0x95a   : > { %s3177_s15 = sld [smem:[#allocation27_spill]] }
 0x95e   : > { %s1701_s26 = sand.u32 1, %s3175_s19  }
 0x95f   : > { %p3178_p3 = scmp.ne.s32.totalorder %s3176_s20, 0  ;;  %s1702_s23 = scalar_lea.sflag [#allocation6], %s1701_s26 }
 0x960   : > { %p3179_p5 = scmp.ge.s32.totalorder %s3177_s15, 2 }
 0x962   : > { %p2106_p4 = pnand %p3179_p5, %p3178_p3 }
 0x964   : > { %p2107_p0 = pneg %p2106_p4 }
 0x966   : > { %2530 = dma.done.wait (%p2107_p0), %s1702_s23, 128  }
 0x967   : > { %2532 = vsyncadd (%p2107_p0), %s1702_s23, 4294967168  ;;  %s3180_s1 = sld [smem:[#allocation28_spill]]  ;;  %s3183_s30 = smov %s2539_s0 }
 0x968   : > { %s3181_s21 = sld [smem:[#allocation26_spill]] }
 0x969   : > { %s3182_s19 = sld [smem:[#allocation29_spill]] }
 0x96d   : > { %p38_p6 = scmp.ge.s32.totalorder %s3180_s1, 4  }
 0x96e   : > { %s3184_s0 = smov %s3181_s21 }
 0x96f   :  { %40 = sbr.rel (!%p38_p6) target bundleno = 30 (0x1e), region = 170 }
 0x974   :  { %1707 = vsyncpa [#allocation5], 1 }
 0x975   :  { %1709 = vsyncpa [#allocation5 + $0x1], 1 }
 0x976   :  { %1710 = vsyncpa [#allocation8], 1 }
 0x977   :  { %1711 = vsyncpa [#allocation12], 1 }
 0x978   :  { %1712 = vsyncpa [#allocation15], 1 }
 0x979   :  { %1713 = vsyncpa [#allocation6], 1 }
 0x97a   :  { %1715 = vsyncpa [#allocation6 + $0x1], 1 }

</bundles_post_ra>
